<compile_context>
chip_gen: v7x
topology: tpu7x:2x2x1
jax: 0.10.0
libtpu: 0.0.40
codegen_flags: <defaults>
</compile_context>

<pallas_src>
import jax
import jax.numpy as jnp
from jax.experimental import pallas as pl
from jax.experimental.pallas import tpu as pltpu

LANE = 128  # lane-dense output width


# ---------------------------------------------------------------------------
# Pallas kernels
# ---------------------------------------------------------------------------
def _conv_relu_pool_kernel(p00_ref, p01_ref, p10_ref, p11_ref, w_ref, b_ref,
                           o_ref):
    """max(4 quadrant matmuls) + bias + ReLU  ==  conv -> ReLU -> 2x2 maxpool."""
    w = w_ref[...]
    acc = jnp.dot(p00_ref[...], w, preferred_element_type=jnp.float32)
    acc = jnp.maximum(acc, jnp.dot(p01_ref[...], w,
                                   preferred_element_type=jnp.float32))
    acc = jnp.maximum(acc, jnp.dot(p10_ref[...], w,
                                   preferred_element_type=jnp.float32))
    acc = jnp.maximum(acc, jnp.dot(p11_ref[...], w,
                                   preferred_element_type=jnp.float32))
    acc = jnp.maximum(acc + b_ref[...], 0.0)
    o_ref[...] = acc.astype(o_ref.dtype)


def _fc_stack_kernel(x_ref, w1_ref, b1_ref, w2_ref, b2_ref, w3_ref, b3_ref,
                     o_ref):
    """fc1 -> ReLU -> fc2 -> ReLU -> out, all weights resident in VMEM."""
    h = jnp.dot(x_ref[...], w1_ref[...], preferred_element_type=jnp.float32)
    h = jnp.maximum(h + b1_ref[...], 0.0)
    h = jnp.dot(h, w2_ref[...], preferred_element_type=jnp.float32)
    h = jnp.maximum(h + b2_ref[...], 0.0)
    h = jnp.dot(h, w3_ref[...], preferred_element_type=jnp.float32)
    o_ref[...] = (h + b3_ref[...]).astype(o_ref.dtype)


# ---------------------------------------------------------------------------
# Row-tiling helper: one block for small M, 256-row parallel blocks otherwise
# ---------------------------------------------------------------------------
def _row_tiling(M, one_block_max=512, tile=256):
    if M <= one_block_max:
        return M, M
    Mp = ((M + tile - 1) // tile) * tile
    return tile, Mp


# ---------------------------------------------------------------------------
# Wrappers
# ---------------------------------------------------------------------------
def conv_relu_pool(x, w_kn, b_1n, kh, kw, c_out):
    """x: NHWC f32.  w_kn: (C_in*kh*kw, 128) pre-padded, b_1n: (1, 128).

    Returns pooled feature map (B, PH, PW, c_out) where PH = (H-kh+1)//2.
    """
    B, H, W, C = x.shape
    PH, PW = (H - kh + 1) // 2, (W - kw + 1) // 2
    K = C * kh * kw
    M = B * PH * PW

    # Four pool-quadrant im2col patch matrices, column order (C_in, kh, kw)
    # so the torch (C_out, C_in, kh, kw) weight flatten applies directly.
    quads = []
    for di in range(2):
        for dj in range(2):
            slices = [x[:, di + r:di + r + 2 * PH:2,
                          dj + s:dj + s + 2 * PW:2, :]
                      for r in range(kh) for s in range(kw)]
            patches = jnp.stack(slices, axis=-1)          # (B,PH,PW,C,kh*kw)
            quads.append(patches.reshape(M, K))

    tm, Mp = _row_tiling(M)
    if Mp != M:
        quads = [jnp.pad(q, ((0, Mp - M), (0, 0))) for q in quads]

    out = pl.pallas_call(
        _conv_relu_pool_kernel,
        out_shape=jax.ShapeDtypeStruct((Mp, LANE), jnp.float32),
        grid=(Mp // tm,),
        in_specs=[pl.BlockSpec((tm, K), lambda i: (i, 0))] * 4 + [
            pl.BlockSpec((K, LANE), lambda i: (0, 0)),
            pl.BlockSpec((1, LANE), lambda i: (0, 0)),
        ],
        out_specs=pl.BlockSpec((tm, LANE), lambda i: (i, 0)),
        compiler_params=pltpu.CompilerParams(
            dimension_semantics=("parallel",)),
    )(*quads, w_kn, b_1n)
    return out[:M, :c_out].reshape(B, PH, PW, c_out)


def fc_stack(x, w1, b1, w2, b2, w3, b3, n_out):
    """x: (B, 192) f32.  Weights pre-padded to lane-dense (K, 128) layouts."""
    M, K = x.shape
    tm, Mp = _row_tiling(M)
    if Mp != M:
        x = jnp.pad(x, ((0, Mp - M), (0, 0)))

    out = pl.pallas_call(
        _fc_stack_kernel,
        out_shape=jax.ShapeDtypeStruct((Mp, LANE), jnp.float32),
        grid=(Mp // tm,),
        in_specs=[
            pl.BlockSpec((tm, K), lambda i: (i, 0)),
            pl.BlockSpec(w1.shape, lambda i: (0, 0)),
            pl.BlockSpec(b1.shape, lambda i: (0, 0)),
            pl.BlockSpec(w2.shape, lambda i: (0, 0)),
            pl.BlockSpec(b2.shape, lambda i: (0, 0)),
            pl.BlockSpec(w3.shape, lambda i: (0, 0)),
            pl.BlockSpec(b3.shape, lambda i: (0, 0)),
        ],
        out_specs=pl.BlockSpec((tm, LANE), lambda i: (i, 0)),
        compiler_params=pltpu.CompilerParams(
            dimension_semantics=("parallel",)),
    )(x, w1, b1, w2, b2, w3, b3)
    return out[:M, :n_out]


# ---------------------------------------------------------------------------
# Parameter handling (torch layouts -> kernel layouts, done ONCE outside jit)
# ---------------------------------------------------------------------------
def init_params(key):
    """Deterministic init mimicking PyTorch's default uniform(-1/sqrt(fan_in))."""
    ks = jax.random.split(key, 10)

    def u(k, shape, fan_in):
        bound = 1.0 / jnp.sqrt(jnp.float32(fan_in))
        return jax.random.uniform(k, shape, jnp.float32, -bound, bound)

    return {
        "conv1_w": u(ks[0], (6, 1, 5, 5), 1 * 5 * 5),
        "conv1_b": u(ks[1], (6,), 1 * 5 * 5),
        "conv2_w": u(ks[2], (12, 6, 5, 5), 6 * 5 * 5),
        "conv2_b": u(ks[3], (12,), 6 * 5 * 5),
        "fc1_w": u(ks[4], (120, 192), 192),
        "fc1_b": u(ks[5], (120,), 192),
        "fc2_w": u(ks[6], (60, 120), 120),
        "fc2_b": u(ks[7], (60,), 120),
        "out_w": u(ks[8], (10, 60), 60),
        "out_b": u(ks[9], (10,), 60),
    }


def prepare_params(p):
    """Pre-transpose / pre-pad all weights to lane-dense (K, 128) kernel layout."""
    def prep_conv(w, b):
        c_out, c_in, kh, kw = w.shape
        k = c_in * kh * kw
        w2 = w.reshape(c_out, k).T.astype(jnp.float32)          # (K, C_out)
        w2 = jnp.pad(w2, ((0, 0), (0, LANE - c_out)))            # (K, 128)
        b2 = jnp.pad(b.reshape(1, c_out).astype(jnp.float32),
                     ((0, 0), (0, LANE - c_out)))                # (1, 128)
        return w2, b2

    def prep_fc(w, b, k_pad):
        n, k = w.shape
        w2 = w.T.astype(jnp.float32)                             # (K, N)
        w2 = jnp.pad(w2, ((0, k_pad - k), (0, LANE - n)))        # (k_pad, 128)
        b2 = jnp.pad(b.reshape(1, n).astype(jnp.float32),
                     ((0, 0), (0, LANE - n)))                    # (1, 128)
        return w2, b2

    c1w, c1b = prep_conv(p["conv1_w"], p["conv1_b"])
    c2w, c2b = prep_conv(p["conv2_w"], p["conv2_b"])
    f1w, f1b = prep_fc(p["fc1_w"], p["fc1_b"], 192)    # (192,128)
    f2w, f2b = prep_fc(p["fc2_w"], p["fc2_b"], LANE)   # (128,128), rows 120.. = 0
    f3w, f3b = prep_fc(p["out_w"], p["out_b"], LANE)   # (128,128), rows  60.. = 0
    return {
        "conv1_w": c1w, "conv1_b": c1b,
        "conv2_w": c2w, "conv2_b": c2b,
        "fc1_w": f1w, "fc1_b": f1b,
        "fc2_w": f2w, "fc2_b": f2b,
        "out_w": f3w, "out_b": f3b,
    }


# ---------------------------------------------------------------------------
# Forward pass
# ---------------------------------------------------------------------------
def network_forward(x_nchw, pp):
    x = jnp.transpose(x_nchw, (0, 2, 3, 1)).astype(jnp.float32)   # NHWC
    x = conv_relu_pool(x, pp["conv1_w"], pp["conv1_b"], 5, 5, 6)  # (B,12,12, 6)
    x = conv_relu_pool(x, pp["conv2_w"], pp["conv2_b"], 5, 5, 12) # (B, 4, 4,12)
    B = x.shape[0]
    # torch's t.reshape(-1, 12*4*4) flattens NCHW order -> transpose first.
    x = jnp.transpose(x, (0, 3, 1, 2)).reshape(B, 12 * 4 * 4)
    return fc_stack(x, pp["fc1_w"], pp["fc1_b"],
                    pp["fc2_w"], pp["fc2_b"],
                    pp["out_w"], pp["out_b"], 10)                 # (B, 10)


if __name__ == "__main__":
    key = jax.random.PRNGKey(0)
    pkey, xkey = jax.random.split(key)
    params = init_params(pkey)
    prepped = jax.tree_util.tree_map(lambda a: a, prepare_params(params))
    # Input shape fixed by the architecture (fc1 expects 12*4*4): (B, 1, 28, 28)
    x = jax.random.normal(xkey, (2, 1, 28, 28), jnp.float32)

    fwd = jax.jit(network_forward)
    y = fwd(x, prepped)
    jax.block_until_ready(y)
    assert y.shape == (2, 10) and y.dtype == jnp.float32
    print("KERNEL_OK")
</pallas_src>

<mosaic_0001>
module attributes {stable_mosaic.version = 11 : i64} {
  func.func @_conv_relu_pool_kernel(%arg0: i32, %arg1: memref<288x25xf32, #tpu.memory_space<vmem>>, %arg2: memref<288x25xf32, #tpu.memory_space<vmem>>, %arg3: memref<288x25xf32, #tpu.memory_space<vmem>>, %arg4: memref<288x25xf32, #tpu.memory_space<vmem>>, %arg5: memref<25x128xf32, #tpu.memory_space<vmem>>, %arg6: memref<1x128xf32, #tpu.memory_space<vmem>>, %arg7: memref<288x128xf32, #tpu.memory_space<vmem>>) attributes {dimension_semantics = [#tpu.dimension_semantics<parallel>], iteration_bounds = array<i64: 1>, scalar_prefetch = 0 : i64, scratch_operands = 0 : i64, tpu.core_type = #tpu.core_type<tc>, window_params = [{transform_indices = @transform_0, window_bounds = array<i64: 288, 25>}, {transform_indices = @transform_1, window_bounds = array<i64: 288, 25>}, {transform_indices = @transform_2, window_bounds = array<i64: 288, 25>}, {transform_indices = @transform_3, window_bounds = array<i64: 288, 25>}, {pipeline_mode = #tpu.pipeline_mode<synchronous>, transform_indices = @transform_4, window_bounds = array<i64: 25, 128>}, {pipeline_mode = #tpu.pipeline_mode<synchronous>, transform_indices = @transform_5, window_bounds = array<i64: 1, 128>}, {transform_indices = @transform_6, window_bounds = array<i64: 288, 128>}]} {
    %c0 = arith.constant 0 : index
    %c0_0 = arith.constant 0 : index
    %0 = vector.load %arg5[%c0, %c0_0] : memref<25x128xf32, #tpu.memory_space<vmem>>, vector<25x128xf32>
    %c0_1 = arith.constant 0 : index
    %c0_2 = arith.constant 0 : index
    %1 = vector.load %arg1[%c0_1, %c0_2] : memref<288x25xf32, #tpu.memory_space<vmem>>, vector<288x25xf32>
    %cst = arith.constant dense<0.000000e+00> : vector<288x128xf32>
    %2 = tpu.matmul %1, %0, %cst {dimension_numbers = #tpu.dot_dimension_numbers<[1], [0], [0], [1], [0, 0, 1, 1], [], []>} : vector<288x25xf32>, vector<25x128xf32>, vector<288x128xf32> -> vector<288x128xf32>
    %c0_3 = arith.constant 0 : index
    %c0_4 = arith.constant 0 : index
    %3 = vector.load %arg2[%c0_3, %c0_4] : memref<288x25xf32, #tpu.memory_space<vmem>>, vector<288x25xf32>
    %cst_5 = arith.constant dense<0.000000e+00> : vector<288x128xf32>
    %4 = tpu.matmul %3, %0, %cst_5 {dimension_numbers = #tpu.dot_dimension_numbers<[1], [0], [0], [1], [0, 0, 1, 1], [], []>} : vector<288x25xf32>, vector<25x128xf32>, vector<288x128xf32> -> vector<288x128xf32>
    %5 = arith.maximumf %2, %4 : vector<288x128xf32>
    %c0_6 = arith.constant 0 : index
    %c0_7 = arith.constant 0 : index
    %6 = vector.load %arg3[%c0_6, %c0_7] : memref<288x25xf32, #tpu.memory_space<vmem>>, vector<288x25xf32>
    %cst_8 = arith.constant dense<0.000000e+00> : vector<288x128xf32>
    %7 = tpu.matmul %6, %0, %cst_8 {dimension_numbers = #tpu.dot_dimension_numbers<[1], [0], [0], [1], [0, 0, 1, 1], [], []>} : vector<288x25xf32>, vector<25x128xf32>, vector<288x128xf32> -> vector<288x128xf32>
    %8 = arith.maximumf %5, %7 : vector<288x128xf32>
    %c0_9 = arith.constant 0 : index
    %c0_10 = arith.constant 0 : index
    %9 = vector.load %arg4[%c0_9, %c0_10] : memref<288x25xf32, #tpu.memory_space<vmem>>, vector<288x25xf32>
    %cst_11 = arith.constant dense<0.000000e+00> : vector<288x128xf32>
    %10 = tpu.matmul %9, %0, %cst_11 {dimension_numbers = #tpu.dot_dimension_numbers<[1], [0], [0], [1], [0, 0, 1, 1], [], []>} : vector<288x25xf32>, vector<25x128xf32>, vector<288x128xf32> -> vector<288x128xf32>
    %11 = arith.maximumf %8, %10 : vector<288x128xf32>
    %c0_12 = arith.constant 0 : index
    %c0_13 = arith.constant 0 : index
    %12 = vector.load %arg6[%c0_12, %c0_13] : memref<1x128xf32, #tpu.memory_space<vmem>>, vector<1x128xf32>
    %13 = vector.broadcast %12 : vector<1x128xf32> to vector<288x128xf32>
    %14 = arith.addf %11, %13 : vector<288x128xf32>
    %cst_14 = arith.constant 0.000000e+00 : f32
    %15 = vector.broadcast %cst_14 : f32 to vector<288x128xf32>
    %16 = arith.maximumf %14, %15 : vector<288x128xf32>
    %c0_15 = arith.constant 0 : index
    %c0_16 = arith.constant 0 : index
    %17 = vector.load %arg7[%c0_15, %c0_16] : memref<288x128xf32, #tpu.memory_space<vmem>>, vector<288x128xf32>
    tpu.vector_store %arg7[%c0_15, %c0_16], %16 {strides = array<i32>} : memref<288x128xf32, #tpu.memory_space<vmem>>, vector<288x128xf32>,
    return
  }
  func.func @transform_0(%arg0: i32) -> (i32, i32) {
    %c0_i32 = arith.constant 0 : i32
    %c0_i32_0 = arith.constant 0 : i32
    return %arg0, %c0_i32 : i32, i32
  }
  func.func @transform_1(%arg0: i32) -> (i32, i32) {
    %c0_i32 = arith.constant 0 : i32
    %c0_i32_0 = arith.constant 0 : i32
    return %arg0, %c0_i32 : i32, i32
  }
  func.func @transform_2(%arg0: i32) -> (i32, i32) {
    %c0_i32 = arith.constant 0 : i32
    %c0_i32_0 = arith.constant 0 : i32
    return %arg0, %c0_i32 : i32, i32
  }
  func.func @transform_3(%arg0: i32) -> (i32, i32) {
    %c0_i32 = arith.constant 0 : i32
    %c0_i32_0 = arith.constant 0 : i32
    return %arg0, %c0_i32 : i32, i32
  }
  func.func @transform_4(%arg0: i32) -> (i32, i32) {
    %c0_i32 = arith.constant 0 : i32
    %c0_i32_0 = arith.constant 0 : i32
    %c0_i32_1 = arith.constant 0 : i32
    return %c0_i32, %c0_i32_0 : i32, i32
  }
  func.func @transform_5(%arg0: i32) -> (i32, i32) {
    %c0_i32 = arith.constant 0 : i32
    %c0_i32_0 = arith.constant 0 : i32
    %c0_i32_1 = arith.constant 0 : i32
    return %c0_i32, %c0_i32_0 : i32, i32
  }
  func.func @transform_6(%arg0: i32) -> (i32, i32) {
    %c0_i32 = arith.constant 0 : i32
    %c0_i32_0 = arith.constant 0 : i32
    return %arg0, %c0_i32 : i32, i32
  }
}

module attributes {stable_mosaic.version = 11 : i64} {
  func.func @_conv_relu_pool_kernel(%arg0: i32, %arg1: memref<32x150xf32, #tpu.memory_space<vmem>>, %arg2: memref<32x150xf32, #tpu.memory_space<vmem>>, %arg3: memref<32x150xf32, #tpu.memory_space<vmem>>, %arg4: memref<32x150xf32, #tpu.memory_space<vmem>>, %arg5: memref<150x128xf32, #tpu.memory_space<vmem>>, %arg6: memref<1x128xf32, #tpu.memory_space<vmem>>, %arg7: memref<32x128xf32, #tpu.memory_space<vmem>>) attributes {dimension_semantics = [#tpu.dimension_semantics<parallel>], iteration_bounds = array<i64: 1>, scalar_prefetch = 0 : i64, scratch_operands = 0 : i64, tpu.core_type = #tpu.core_type<tc>, window_params = [{transform_indices = @transform_0, window_bounds = array<i64: 32, 150>}, {transform_indices = @transform_1, window_bounds = array<i64: 32, 150>}, {transform_indices = @transform_2, window_bounds = array<i64: 32, 150>}, {transform_indices = @transform_3, window_bounds = array<i64: 32, 150>}, {pipeline_mode = #tpu.pipeline_mode<synchronous>, transform_indices = @transform_4, window_bounds = array<i64: 150, 128>}, {pipeline_mode = #tpu.pipeline_mode<synchronous>, transform_indices = @transform_5, window_bounds = array<i64: 1, 128>}, {transform_indices = @transform_6, window_bounds = array<i64: 32, 128>}]} {
    %c0 = arith.constant 0 : index
    %c0_0 = arith.constant 0 : index
    %0 = vector.load %arg5[%c0, %c0_0] : memref<150x128xf32, #tpu.memory_space<vmem>>, vector<150x128xf32>
    %c0_1 = arith.constant 0 : index
    %c0_2 = arith.constant 0 : index
    %1 = vector.load %arg1[%c0_1, %c0_2] : memref<32x150xf32, #tpu.memory_space<vmem>>, vector<32x150xf32>
    %cst = arith.constant dense<0.000000e+00> : vector<32x128xf32>
    %2 = tpu.matmul %1, %0, %cst {dimension_numbers = #tpu.dot_dimension_numbers<[1], [0], [0], [1], [0, 0, 1, 1], [], []>} : vector<32x150xf32>, vector<150x128xf32>, vector<32x128xf32> -> vector<32x128xf32>
    %c0_3 = arith.constant 0 : index
    %c0_4 = arith.constant 0 : index
    %3 = vector.load %arg2[%c0_3, %c0_4] : memref<32x150xf32, #tpu.memory_space<vmem>>, vector<32x150xf32>
    %cst_5 = arith.constant dense<0.000000e+00> : vector<32x128xf32>
    %4 = tpu.matmul %3, %0, %cst_5 {dimension_numbers = #tpu.dot_dimension_numbers<[1], [0], [0], [1], [0, 0, 1, 1], [], []>} : vector<32x150xf32>, vector<150x128xf32>, vector<32x128xf32> -> vector<32x128xf32>
    %5 = arith.maximumf %2, %4 : vector<32x128xf32>
    %c0_6 = arith.constant 0 : index
    %c0_7 = arith.constant 0 : index
    %6 = vector.load %arg3[%c0_6, %c0_7] : memref<32x150xf32, #tpu.memory_space<vmem>>, vector<32x150xf32>
    %cst_8 = arith.constant dense<0.000000e+00> : vector<32x128xf32>
    %7 = tpu.matmul %6, %0, %cst_8 {dimension_numbers = #tpu.dot_dimension_numbers<[1], [0], [0], [1], [0, 0, 1, 1], [], []>} : vector<32x150xf32>, vector<150x128xf32>, vector<32x128xf32> -> vector<32x128xf32>
    %8 = arith.maximumf %5, %7 : vector<32x128xf32>
    %c0_9 = arith.constant 0 : index
    %c0_10 = arith.constant 0 : index
    %9 = vector.load %arg4[%c0_9, %c0_10] : memref<32x150xf32, #tpu.memory_space<vmem>>, vector<32x150xf32>
    %cst_11 = arith.constant dense<0.000000e+00> : vector<32x128xf32>
    %10 = tpu.matmul %9, %0, %cst_11 {dimension_numbers = #tpu.dot_dimension_numbers<[1], [0], [0], [1], [0, 0, 1, 1], [], []>} : vector<32x150xf32>, vector<150x128xf32>, vector<32x128xf32> -> vector<32x128xf32>
    %11 = arith.maximumf %8, %10 : vector<32x128xf32>
    %c0_12 = arith.constant 0 : index
    %c0_13 = arith.constant 0 : index
    %12 = vector.load %arg6[%c0_12, %c0_13] : memref<1x128xf32, #tpu.memory_space<vmem>>, vector<1x128xf32>
    %13 = vector.broadcast %12 : vector<1x128xf32> to vector<32x128xf32>
    %14 = arith.addf %11, %13 : vector<32x128xf32>
    %cst_14 = arith.constant 0.000000e+00 : f32
    %15 = vector.broadcast %cst_14 : f32 to vector<32x128xf32>
    %16 = arith.maximumf %14, %15 : vector<32x128xf32>
    %c0_15 = arith.constant 0 : index
    %c0_16 = arith.constant 0 : index
    %17 = vector.load %arg7[%c0_15, %c0_16] : memref<32x128xf32, #tpu.memory_space<vmem>>, vector<32x128xf32>
    tpu.vector_store %arg7[%c0_15, %c0_16], %16 {strides = array<i32>} : memref<32x128xf32, #tpu.memory_space<vmem>>, vector<32x128xf32>,
    return
  }
  func.func @transform_0(%arg0: i32) -> (i32, i32) {
    %c0_i32 = arith.constant 0 : i32
    %c0_i32_0 = arith.constant 0 : i32
    return %arg0, %c0_i32 : i32, i32
  }
  func.func @transform_1(%arg0: i32) -> (i32, i32) {
    %c0_i32 = arith.constant 0 : i32
    %c0_i32_0 = arith.constant 0 : i32
    return %arg0, %c0_i32 : i32, i32
  }
  func.func @transform_2(%arg0: i32) -> (i32, i32) {
    %c0_i32 = arith.constant 0 : i32
    %c0_i32_0 = arith.constant 0 : i32
    return %arg0, %c0_i32 : i32, i32
  }
  func.func @transform_3(%arg0: i32) -> (i32, i32) {
    %c0_i32 = arith.constant 0 : i32
    %c0_i32_0 = arith.constant 0 : i32
    return %arg0, %c0_i32 : i32, i32
  }
  func.func @transform_4(%arg0: i32) -> (i32, i32) {
    %c0_i32 = arith.constant 0 : i32
    %c0_i32_0 = arith.constant 0 : i32
    %c0_i32_1 = arith.constant 0 : i32
    return %c0_i32, %c0_i32_0 : i32, i32
  }
  func.func @transform_5(%arg0: i32) -> (i32, i32) {
    %c0_i32 = arith.constant 0 : i32
    %c0_i32_0 = arith.constant 0 : i32
    %c0_i32_1 = arith.constant 0 : i32
    return %c0_i32, %c0_i32_0 : i32, i32
  }
  func.func @transform_6(%arg0: i32) -> (i32, i32) {
    %c0_i32 = arith.constant 0 : i32
    %c0_i32_0 = arith.constant 0 : i32
    return %arg0, %c0_i32 : i32, i32
  }
}

module attributes {stable_mosaic.version = 11 : i64} {
  func.func @_fc_stack_kernel(%arg0: i32, %arg1: memref<2x192xf32, #tpu.memory_space<vmem>>, %arg2: memref<192x128xf32, #tpu.memory_space<vmem>>, %arg3: memref<1x128xf32, #tpu.memory_space<vmem>>, %arg4: memref<128x128xf32, #tpu.memory_space<vmem>>, %arg5: memref<1x128xf32, #tpu.memory_space<vmem>>, %arg6: memref<128x128xf32, #tpu.memory_space<vmem>>, %arg7: memref<1x128xf32, #tpu.memory_space<vmem>>, %arg8: memref<2x128xf32, #tpu.memory_space<vmem>>) attributes {dimension_semantics = [#tpu.dimension_semantics<parallel>], iteration_bounds = array<i64: 1>, scalar_prefetch = 0 : i64, scratch_operands = 0 : i64, tpu.core_type = #tpu.core_type<tc>, window_params = [{transform_indices = @transform_0, window_bounds = array<i64: 2, 192>}, {pipeline_mode = #tpu.pipeline_mode<synchronous>, transform_indices = @transform_1, window_bounds = array<i64: 192, 128>}, {pipeline_mode = #tpu.pipeline_mode<synchronous>, transform_indices = @transform_2, window_bounds = array<i64: 1, 128>}, {pipeline_mode = #tpu.pipeline_mode<synchronous>, transform_indices = @transform_3, window_bounds = array<i64: 128, 128>}, {pipeline_mode = #tpu.pipeline_mode<synchronous>, transform_indices = @transform_4, window_bounds = array<i64: 1, 128>}, {pipeline_mode = #tpu.pipeline_mode<synchronous>, transform_indices = @transform_5, window_bounds = array<i64: 128, 128>}, {pipeline_mode = #tpu.pipeline_mode<synchronous>, transform_indices = @transform_6, window_bounds = array<i64: 1, 128>}, {transform_indices = @transform_7, window_bounds = array<i64: 2, 128>}]} {
    %c0 = arith.constant 0 : index
    %c0_0 = arith.constant 0 : index
    %0 = vector.load %arg1[%c0, %c0_0] : memref<2x192xf32, #tpu.memory_space<vmem>>, vector<2x192xf32>
    %c0_1 = arith.constant 0 : index
    %c0_2 = arith.constant 0 : index
    %1 = vector.load %arg2[%c0_1, %c0_2] : memref<192x128xf32, #tpu.memory_space<vmem>>, vector<192x128xf32>
    %cst = arith.constant dense<0.000000e+00> : vector<2x128xf32>
    %2 = tpu.matmul %0, %1, %cst {dimension_numbers = #tpu.dot_dimension_numbers<[1], [0], [0], [1], [0, 0, 1, 1], [], []>} : vector<2x192xf32>, vector<192x128xf32>, vector<2x128xf32> -> vector<2x128xf32>
    %c0_3 = arith.constant 0 : index
    %c0_4 = arith.constant 0 : index
    %3 = vector.load %arg3[%c0_3, %c0_4] : memref<1x128xf32, #tpu.memory_space<vmem>>, vector<1x128xf32>
    %4 = vector.broadcast %3 : vector<1x128xf32> to vector<2x128xf32>
    %5 = arith.addf %2, %4 : vector<2x128xf32>
    %cst_5 = arith.constant 0.000000e+00 : f32
    %6 = vector.broadcast %cst_5 : f32 to vector<2x128xf32>
    %7 = arith.maximumf %5, %6 : vector<2x128xf32>
    %c0_6 = arith.constant 0 : index
    %c0_7 = arith.constant 0 : index
    %8 = vector.load %arg4[%c0_6, %c0_7] : memref<128x128xf32, #tpu.memory_space<vmem>>, vector<128x128xf32>
    %cst_8 = arith.constant dense<0.000000e+00> : vector<2x128xf32>
    %9 = tpu.matmul %7, %8, %cst_8 {dimension_numbers = #tpu.dot_dimension_numbers<[1], [0], [0], [1], [0, 0, 1, 1], [], []>} : vector<2x128xf32>, vector<128x128xf32>, vector<2x128xf32> -> vector<2x128xf32>
    %c0_9 = arith.constant 0 : index
    %c0_10 = arith.constant 0 : index
    %10 = vector.load %arg5[%c0_9, %c0_10] : memref<1x128xf32, #tpu.memory_space<vmem>>, vector<1x128xf32>
    %11 = vector.broadcast %10 : vector<1x128xf32> to vector<2x128xf32>
    %12 = arith.addf %9, %11 : vector<2x128xf32>
    %cst_11 = arith.constant 0.000000e+00 : f32
    %13 = vector.broadcast %cst_11 : f32 to vector<2x128xf32>
    %14 = arith.maximumf %12, %13 : vector<2x128xf32>
    %c0_12 = arith.constant 0 : index
    %c0_13 = arith.constant 0 : index
    %15 = vector.load %arg6[%c0_12, %c0_13] : memref<128x128xf32, #tpu.memory_space<vmem>>, vector<128x128xf32>
    %cst_14 = arith.constant dense<0.000000e+00> : vector<2x128xf32>
    %16 = tpu.matmul %14, %15, %cst_14 {dimension_numbers = #tpu.dot_dimension_numbers<[1], [0], [0], [1], [0, 0, 1, 1], [], []>} : vector<2x128xf32>, vector<128x128xf32>, vector<2x128xf32> -> vector<2x128xf32>
    %c0_15 = arith.constant 0 : index
    %c0_16 = arith.constant 0 : index
    %17 = vector.load %arg7[%c0_15, %c0_16] : memref<1x128xf32, #tpu.memory_space<vmem>>, vector<1x128xf32>
    %18 = vector.broadcast %17 : vector<1x128xf32> to vector<2x128xf32>
    %19 = arith.addf %16, %18 : vector<2x128xf32>
    %c0_17 = arith.constant 0 : index
    %c0_18 = arith.constant 0 : index
    %20 = vector.load %arg8[%c0_17, %c0_18] : memref<2x128xf32, #tpu.memory_space<vmem>>, vector<2x128xf32>
    tpu.vector_store %arg8[%c0_17, %c0_18], %19 {strides = array<i32>} : memref<2x128xf32, #tpu.memory_space<vmem>>, vector<2x128xf32>,
    return
  }
  func.func @transform_0(%arg0: i32) -> (i32, i32) {
    %c0_i32 = arith.constant 0 : i32
    %c0_i32_0 = arith.constant 0 : i32
    return %arg0, %c0_i32 : i32, i32
  }
  func.func @transform_1(%arg0: i32) -> (i32, i32) {
    %c0_i32 = arith.constant 0 : i32
    %c0_i32_0 = arith.constant 0 : i32
    %c0_i32_1 = arith.constant 0 : i32
    return %c0_i32, %c0_i32_0 : i32, i32
  }
  func.func @transform_2(%arg0: i32) -> (i32, i32) {
    %c0_i32 = arith.constant 0 : i32
    %c0_i32_0 = arith.constant 0 : i32
    %c0_i32_1 = arith.constant 0 : i32
    return %c0_i32, %c0_i32_0 : i32, i32
  }
  func.func @transform_3(%arg0: i32) -> (i32, i32) {
    %c0_i32 = arith.constant 0 : i32
    %c0_i32_0 = arith.constant 0 : i32
    %c0_i32_1 = arith.constant 0 : i32
    return %c0_i32, %c0_i32_0 : i32, i32
  }
  func.func @transform_4(%arg0: i32) -> (i32, i32) {
    %c0_i32 = arith.constant 0 : i32
    %c0_i32_0 = arith.constant 0 : i32
    %c0_i32_1 = arith.constant 0 : i32
    return %c0_i32, %c0_i32_0 : i32, i32
  }
  func.func @transform_5(%arg0: i32) -> (i32, i32) {
    %c0_i32 = arith.constant 0 : i32
    %c0_i32_0 = arith.constant 0 : i32
    %c0_i32_1 = arith.constant 0 : i32
    return %c0_i32, %c0_i32_0 : i32, i32
  }
  func.func @transform_6(%arg0: i32) -> (i32, i32) {
    %c0_i32 = arith.constant 0 : i32
    %c0_i32_0 = arith.constant 0 : i32
    %c0_i32_1 = arith.constant 0 : i32
    return %c0_i32, %c0_i32_0 : i32, i32
  }
  func.func @transform_7(%arg0: i32) -> (i32, i32) {
    %c0_i32 = arith.constant 0 : i32
    %c0_i32_0 = arith.constant 0 : i32
    return %arg0, %c0_i32 : i32, i32
  }
}

</mosaic_0001>

<bundles_post_ra>
// kernel: network_forward.3
= control target key start
LH: loop header
LB: loop body
LE: loop exit
PB: predicated region body
PF: predicated region fallthrough
CT: control target
= control target key end

     0   :  { %vm172_vm0 = vcmask 1040384   ;;  %vm63_vm1 = vcmask 203776   ;;  %vm2413_vm2 = vmmov 1   ;;  %s3530_s4 = inlined_call_operand.vmem [shape: f32[25,128], index: 4, kind: input, shape index: {}]   ;;  %s3531_s0 = inlined_call_operand.vmem [shape: f32[288,25], index: 0, kind: input, shape index: {}]   ;;  %s3532_s1 = inlined_call_operand.vmem [shape: f32[288,25], index: 1, kind: input, shape index: {}]   ;;  %s3533_s2 = inlined_call_operand.vmem [shape: f32[288,25], index: 2, kind: input, shape index: {}]   ;;  %s3534_s3 = inlined_call_operand.vmem [shape: f32[288,25], index: 3, kind: input, shape index: {}]   ;;  %s3535_s5 = inlined_call_operand.vmem [shape: f32[1,128], index: 5, kind: input, shape index: {}]   ;;  %s3536_s6 = inlined_call_operand.vmem [shape: f32[288,128], index: 6, kind: output, shape index: {}]  }
   0x1   :  { %v23_v0 = vld [vmem:[%s3530_s4] sm:$0xff]  ;;  %v24_v1 = vld [vmem:[%s3530_s4 + $0x8] sm:$0xff]  ;;  %v25_v2 = vld [vmem:[%s3530_s4 + $0x10] sm:$0xff] }
   0x2   :  { %v2372_v3 = vpack.c.bf16 %v24_v1, %v23_v0  ;;  %v26_v4 = vld [vmem:[%s3530_s4 + $0x18] sm:$0x1]  ;;  %v27_v5 = vld [vmem:[%s3531_s0] sm:$0xff]  ;;  %vm2464_vm3 = vmpackc.low %vm172_vm0, %vm2413_vm2 }
   0x3   :  { %v2376_v6 = vpack.c.bf16 %v26_v4, %v25_v2  ;;  %2132 = vmatprep.mubr.msk.f32.mxu0 %vm63_vm1, %v27_v5  ;;  %v421_v8 = vld [vmem:[%s3532_s1] sm:$0xff]  ;;  %v28_v9 = vld [vmem:[%s3531_s0 + $0x8] sm:$0xff]  ;;  %v29_v11 = vld [vmem:[%s3531_s0 + $0x10] sm:$0xff] }
   0x4   :  { %2373 = vmatprep.subr.bf16.mxu0 %v2372_v3  ;;  %2383 = vmatprep.subr.bf16.mxu1 %v2372_v3  ;;  %v422_v10 = vld [vmem:[%s3532_s1 + $0x8] sm:$0xff]  ;;  %v423_v12 = vld [vmem:[%s3532_s1 + $0x10] sm:$0xff]  ;;  %v30_v13 = vld [vmem:[%s3531_s0 + $0x18] sm:$0xff] }
   0x5   :  { %2375 = vmatpush3.bf16.msra.mxu0 %v2372_v3  ;;  %2385 = vmatpush3.bf16.msra.mxu1 %v2372_v3  ;;  %v424_v14 = vld [vmem:[%s3532_s1 + $0x18] sm:$0xff]  ;;  %v31_v15 = vld [vmem:[%s3531_s0 + $0x20] sm:$0xff]  ;;  %v32_v17 = vld [vmem:[%s3531_s0 + $0x28] sm:$0xff] }
   0x6   :  { %2378 = vmatprep.subr.msk.bf16.mxu0 %vm2464_vm3, %v2376_v6  ;;  %2388 = vmatprep.subr.msk.bf16.mxu1 %vm2464_vm3, %v2376_v6  ;;  %v425_v16 = vld [vmem:[%s3532_s1 + $0x20] sm:$0xff]  ;;  %v426_v18 = vld [vmem:[%s3532_s1 + $0x28] sm:$0xff]  ;;  %v33_v19 = vld [vmem:[%s3531_s0 + $0x30] sm:$0xff] }
   0x7   :  { %2194 = vmatprep.mubr.msk.f32.mxu1 %vm63_vm1, %v421_v8  ;;  %v427_v20 = vld [vmem:[%s3532_s1 + $0x30] sm:$0xff]  ;;  %v34_v21 = vld [vmem:[%s3531_s0 + $0x38] sm:$0xff]  ;;  %v35_v23 = vld [vmem:[%s3531_s0 + $0x40] sm:$0xff] }
   0x8   :  { %v428_v22 = vld [vmem:[%s3532_s1 + $0x38] sm:$0xff]  ;;  %v429_v24 = vld [vmem:[%s3532_s1 + $0x40] sm:$0xff]  ;;  %v36_v25 = vld [vmem:[%s3531_s0 + $0x48] sm:$0xff] }
   0x9   :  { %2381 = vmatpush3.bf16.msk.msra.mxu0 %vm2464_vm3, %v2376_v6  ;;  %2391 = vmatpush3.bf16.msk.msra.mxu1 %vm2464_vm3, %v2376_v6  ;;  %v430_v26 = vld [vmem:[%s3532_s1 + $0x48] sm:$0xff]  ;;  %v37_v27 = vld [vmem:[%s3531_s0 + $0x50] sm:$0xff]  ;;  %v38_v29 = vld [vmem:[%s3531_s0 + $0x58] sm:$0xff] }
   0xa   :  { %2393 = vmatprep.subr.bf16.mxu0 %v2372_v3  ;;  %2403 = vmatprep.subr.bf16.mxu1 %v2372_v3  ;;  %v431_v28 = vld [vmem:[%s3532_s1 + $0x50] sm:$0xff]  ;;  %v432_v30 = vld [vmem:[%s3532_s1 + $0x58] sm:$0xff]  ;;  %v39_v31 = vld [vmem:[%s3531_s0 + $0x60] sm:$0xff] }
   0xb   :  { %v433_v32 = vld [vmem:[%s3532_s1 + $0x60] sm:$0xff]  ;;  %v40_v33 = vld [vmem:[%s3531_s0 + $0x68] sm:$0xff]  ;;  %v41_v35 = vld [vmem:[%s3531_s0 + $0x70] sm:$0xff] }
   0xc   :  { %2133 = vmatmul.mubr.msk.f32.vlgmr.msra.gmra.mrb[0].mxu0 %vm63_vm1, %v28_v9  ;;  %2195 = vmatmul.mubr.msk.f32.vlgmr.msra.gmra.mrb[0].mxu1 %vm63_vm1, %v422_v10  ;;  %v434_v34 = vld [vmem:[%s3532_s1 + $0x68] sm:$0xff]  ;;  %v435_v36 = vld [vmem:[%s3532_s1 + $0x70] sm:$0xff]  ;;  %v42_v37 = vld [vmem:[%s3531_s0 + $0x78] sm:$0xff] }
   0xd   :  { %2395 = vmatpush3.bf16.msra.mxu0 %v2372_v3  ;;  %2135 = vmatprep.mubr.msk.f32.mxu0 %vm63_vm1, %v29_v11  ;;  %v436_v38 = vld [vmem:[%s3532_s1 + $0x78] sm:$0xff]  ;;  %v43_v39 = vld [vmem:[%s3531_s0 + $0x80] sm:$0xff]  ;;  %v44_v41 = vld [vmem:[%s3531_s0 + $0x88] sm:$0xff] }
   0xe   :  { %2197 = vmatprep.mubr.msk.f32.mxu1 %vm63_vm1, %v423_v12  ;;  %2405 = vmatpush3.bf16.msra.mxu1 %v2372_v3  ;;  %v437_v40 = vld [vmem:[%s3532_s1 + $0x80] sm:$0xff]  ;;  %v438_v42 = vld [vmem:[%s3532_s1 + $0x88] sm:$0xff]  ;;  %v45_v43 = vld [vmem:[%s3531_s0 + $0x90] sm:$0xff] }
   0xf   :  { %2398 = vmatprep.subr.msk.bf16.mxu0 %vm2464_vm3, %v2376_v6  ;;  %2408 = vmatprep.subr.msk.bf16.mxu1 %vm2464_vm3, %v2376_v6  ;;  %v439_v44 = vld [vmem:[%s3532_s1 + $0x90] sm:$0xff]  ;;  %v46_v45 = vld [vmem:[%s3531_s0 + $0x98] sm:$0xff]  ;;  %v47_v47 = vld [vmem:[%s3531_s0 + $0xa0] sm:$0xff] }
  0x10   :  { %2136 = vmatmul.mubr.msk.f32.gmra.mrb[2].mxu0 %vm63_vm1, %v30_v13  ;;  %2198 = vmatmul.mubr.msk.f32.gmra.mrb[2].mxu1 %vm63_vm1, %v424_v14  ;;  %v440_v46 = vld [vmem:[%s3532_s1 + $0x98] sm:$0xff]  ;;  %v441_v48 = vld [vmem:[%s3532_s1 + $0xa0] sm:$0xff]  ;;  %v48_v49 = vld [vmem:[%s3531_s0 + $0xa8] sm:$0xff] }
  0x11   :  { %2138 = vmatprep.mubr.msk.f32.mxu0 %vm63_vm1, %v31_v15  ;;  %2200 = vmatprep.mubr.msk.f32.mxu1 %vm63_vm1, %v425_v16  ;;  %v442_v50 = vld [vmem:[%s3532_s1 + $0xa8] sm:$0xff]  ;;  %v49_v51 = vld [vmem:[%s3531_s0 + $0xb0] sm:$0xff]  ;;  %v50_v53 = vld [vmem:[%s3531_s0 + $0xb8] sm:$0xff] }
  0x12   :  { %2401 = vmatpush3.bf16.msk.msra.mxu0 %vm2464_vm3, %v2376_v6  ;;  %2411 = vmatpush3.bf16.msk.msra.mxu1 %vm2464_vm3, %v2376_v6  ;;  %v443_v52 = vld [vmem:[%s3532_s1 + $0xb0] sm:$0xff]  ;;  %v444_v54 = vld [vmem:[%s3532_s1 + $0xb8] sm:$0xff]  ;;  %v51_v55 = vld [vmem:[%s3531_s0 + $0xc0] sm:$0xff] }
  0x13   :  { %v445_v56 = vld [vmem:[%s3532_s1 + $0xc0] sm:$0xff]  ;;  %v52_v57 = vld [vmem:[%s3531_s0 + $0xc8] sm:$0xff]  ;;  %v53_v59 = vld [vmem:[%s3531_s0 + $0xd0] sm:$0xff] }
  0x14   :  { %2139 = vmatmul.mubr.msk.f32.gmra.mrb[4].mxu0 %vm63_vm1, %v32_v17  ;;  %2201 = vmatmul.mubr.msk.f32.gmra.mrb[4].mxu1 %vm63_vm1, %v426_v18  ;;  %v446_v58 = vld [vmem:[%s3532_s1 + $0xc8] sm:$0xff]  ;;  %v447_v60 = vld [vmem:[%s3532_s1 + $0xd0] sm:$0xff]  ;;  %v54_v61 = vld [vmem:[%s3531_s0 + $0xd8] sm:$0xff] }
  0x15   :  { %2141 = vmatprep.mubr.msk.f32.mxu0 %vm63_vm1, %v33_v19  ;;  %2203 = vmatprep.mubr.msk.f32.mxu1 %vm63_vm1, %v427_v20  ;;  %v448_v62 = vld [vmem:[%s3532_s1 + $0xd8] sm:$0xff]  ;;  %v55_v63 = vld [vmem:[%s3531_s0 + $0xe0] sm:$0xff]  ;;  %v56_v1 = vld [vmem:[%s3531_s0 + $0xe8] sm:$0xff] }
  0x16   :  { %v449_v0 = vld [vmem:[%s3532_s1 + $0xe0] sm:$0xff]  ;;  %v450_v2 = vld [vmem:[%s3532_s1 + $0xe8] sm:$0xff]  ;;  %v57_v3 = vld [vmem:[%s3531_s0 + $0xf0] sm:$0xff] }
  0x17   :  { %v451_v4 = vld [vmem:[%s3532_s1 + $0xf0] sm:$0xff]  ;;  %v58_v5 = vld [vmem:[%s3531_s0 + $0xf8] sm:$0xff]  ;;  %v59_v7 = vld [vmem:[%s3531_s0 + $0x100] sm:$0xff] }
  0x18   :  { %2142 = vmatmul.mubr.msk.f32.gmra.mrb[6].mxu0 %vm63_vm1, %v34_v21  ;;  %2204 = vmatmul.mubr.msk.f32.gmra.mrb[6].mxu1 %vm63_vm1, %v428_v22  ;;  %v452_v6 = vld [vmem:[%s3532_s1 + $0xf8] sm:$0xff]  ;;  %v453_v8 = vld [vmem:[%s3532_s1 + $0x100] sm:$0xff]  ;;  %v60_v9 = vld [vmem:[%s3531_s0 + $0x108] sm:$0xff] }
  0x19   :  { %2144 = vmatprep.mubr.msk.f32.mxu0 %vm63_vm1, %v35_v23  ;;  %2206 = vmatprep.mubr.msk.f32.mxu1 %vm63_vm1, %v429_v24  ;;  %v454_v10 = vld [vmem:[%s3532_s1 + $0x108] sm:$0xff]  ;;  %v61_v11 = vld [vmem:[%s3531_s0 + $0x110] sm:$0xff]  ;;  %v62_v13 = vld [vmem:[%s3531_s0 + $0x118] sm:$0xff] }
  0x1a   :  { %v455_v12 = vld [vmem:[%s3532_s1 + $0x110] sm:$0xff]  ;;  %v456_v14 = vld [vmem:[%s3532_s1 + $0x118] sm:$0xff]  ;;  %v846_v15 = vld [vmem:[%s3533_s2] sm:$0xff] }
  0x1b   :  { %v1271_v16 = vld [vmem:[%s3534_s3] sm:$0xff]  ;;  %v847_v17 = vld [vmem:[%s3533_s2 + $0x8] sm:$0xff]  ;;  %v848_v19 = vld [vmem:[%s3533_s2 + $0x10] sm:$0xff] }
  0x1c   :  { %2145 = vmatmul.mubr.msk.f32.gmra.mrb[8].mxu0 %vm63_vm1, %v36_v25  ;;  %2207 = vmatmul.mubr.msk.f32.gmra.mrb[8].mxu1 %vm63_vm1, %v430_v26  ;;  %v1272_v18 = vld [vmem:[%s3534_s3 + $0x8] sm:$0xff]  ;;  %v1273_v20 = vld [vmem:[%s3534_s3 + $0x10] sm:$0xff]  ;;  %v849_v21 = vld [vmem:[%s3533_s2 + $0x18] sm:$0xff] }
  0x1d   :  { %2147 = vmatprep.mubr.msk.f32.mxu0 %vm63_vm1, %v37_v27  ;;  %2209 = vmatprep.mubr.msk.f32.mxu1 %vm63_vm1, %v431_v28  ;;  %v1274_v22 = vld [vmem:[%s3534_s3 + $0x18] sm:$0xff]  ;;  %v850_v23 = vld [vmem:[%s3533_s2 + $0x20] sm:$0xff]  ;;  %v851_v25 = vld [vmem:[%s3533_s2 + $0x28] sm:$0xff] }
  0x1e   :  { %v1275_v24 = vld [vmem:[%s3534_s3 + $0x20] sm:$0xff]  ;;  %v1276_v26 = vld [vmem:[%s3534_s3 + $0x28] sm:$0xff]  ;;  %v852_v27 = vld [vmem:[%s3533_s2 + $0x30] sm:$0xff] }
  0x1f   :  { %v1277_v28 = vld [vmem:[%s3534_s3 + $0x30] sm:$0xff] }
  0x20   :  { %2148 = vmatmul.mubr.msk.f32.gmra.mrb[10].mxu0 %vm63_vm1, %v38_v29  ;;  %2210 = vmatmul.mubr.msk.f32.gmra.mrb[10].mxu1 %vm63_vm1, %v432_v30  ;;  %v853_v29 = vld [vmem:[%s3533_s2 + $0x38] sm:$0xff] }
  0x21   :  { %2150 = vmatprep.mubr.msk.f32.mxu0 %vm63_vm1, %v39_v31  ;;  %2212 = vmatprep.mubr.msk.f32.mxu1 %vm63_vm1, %v433_v32  ;;  %v1278_v30 = vld [vmem:[%s3534_s3 + $0x38] sm:$0xff]  ;;  %v854_v31 = vld [vmem:[%s3533_s2 + $0x40] sm:$0xff] }
  0x22   :  { %v1279_v32 = vld [vmem:[%s3534_s3 + $0x40] sm:$0xff] }
  0x24   :  { %2151 = vmatmul.mubr.msk.f32.gmra.mrb[12].mxu0 %vm63_vm1, %v40_v33  ;;  %2213 = vmatmul.mubr.msk.f32.gmra.mrb[12].mxu1 %vm63_vm1, %v434_v34  ;;  %v855_v33 = vld [vmem:[%s3533_s2 + $0x48] sm:$0xff] }
  0x25   :  { %2153 = vmatprep.mubr.msk.f32.mxu0 %vm63_vm1, %v41_v35  ;;  %2215 = vmatprep.mubr.msk.f32.mxu1 %vm63_vm1, %v435_v36  ;;  %v1280_v34 = vld [vmem:[%s3534_s3 + $0x48] sm:$0xff]  ;;  %v856_v35 = vld [vmem:[%s3533_s2 + $0x50] sm:$0xff] }
  0x26   :  { %v1281_v36 = vld [vmem:[%s3534_s3 + $0x50] sm:$0xff] }
  0x28   :  { %2154 = vmatmul.mubr.msk.f32.gmra.mrb[14].mxu0 %vm63_vm1, %v42_v37  ;;  %2216 = vmatmul.mubr.msk.f32.gmra.mrb[14].mxu1 %vm63_vm1, %v436_v38  ;;  %v857_v37 = vld [vmem:[%s3533_s2 + $0x58] sm:$0xff] }
  0x29   :  { %2156 = vmatprep.mubr.msk.f32.mxu0 %vm63_vm1, %v43_v39  ;;  %2218 = vmatprep.mubr.msk.f32.mxu1 %vm63_vm1, %v437_v40  ;;  %v1282_v38 = vld [vmem:[%s3534_s3 + $0x58] sm:$0xff]  ;;  %v858_v39 = vld [vmem:[%s3533_s2 + $0x60] sm:$0xff] }
  0x2a   :  { %v1283_v40 = vld [vmem:[%s3534_s3 + $0x60] sm:$0xff] }
  0x2c   :  { %2157 = vmatmul.mubr.msk.f32.gmra.mrb[16].mxu0 %vm63_vm1, %v44_v41  ;;  %2219 = vmatmul.mubr.msk.f32.gmra.mrb[16].mxu1 %vm63_vm1, %v438_v42  ;;  %v859_v41 = vld [vmem:[%s3533_s2 + $0x68] sm:$0xff] }
  0x2d   :  { %2159 = vmatprep.mubr.msk.f32.mxu0 %vm63_vm1, %v45_v43  ;;  %2221 = vmatprep.mubr.msk.f32.mxu1 %vm63_vm1, %v439_v44  ;;  %v1284_v42 = vld [vmem:[%s3534_s3 + $0x68] sm:$0xff]  ;;  %v860_v43 = vld [vmem:[%s3533_s2 + $0x70] sm:$0xff] }
  0x2e   :  { %v1285_v44 = vld [vmem:[%s3534_s3 + $0x70] sm:$0xff] }
  0x30   :  { %2160 = vmatmul.mubr.msk.f32.gmra.mrb[18].mxu0 %vm63_vm1, %v46_v45  ;;  %2222 = vmatmul.mubr.msk.f32.gmra.mrb[18].mxu1 %vm63_vm1, %v440_v46  ;;  %v861_v45 = vld [vmem:[%s3533_s2 + $0x78] sm:$0xff] }
  0x31   :  { %2162 = vmatprep.mubr.msk.f32.mxu0 %vm63_vm1, %v47_v47  ;;  %2224 = vmatprep.mubr.msk.f32.mxu1 %vm63_vm1, %v441_v48  ;;  %v1286_v46 = vld [vmem:[%s3534_s3 + $0x78] sm:$0xff]  ;;  %v862_v47 = vld [vmem:[%s3533_s2 + $0x80] sm:$0xff] }
  0x32   :  { %v1287_v48 = vld [vmem:[%s3534_s3 + $0x80] sm:$0xff] }
  0x34   :  { %2163 = vmatmul.mubr.msk.f32.gmra.mrb[20].mxu0 %vm63_vm1, %v48_v49  ;;  %2225 = vmatmul.mubr.msk.f32.gmra.mrb[20].mxu1 %vm63_vm1, %v442_v50  ;;  %v863_v49 = vld [vmem:[%s3533_s2 + $0x88] sm:$0xff] }
  0x35   :  { %2165 = vmatprep.mubr.msk.f32.mxu0 %vm63_vm1, %v49_v51  ;;  %2227 = vmatprep.mubr.msk.f32.mxu1 %vm63_vm1, %v443_v52  ;;  %v1288_v50 = vld [vmem:[%s3534_s3 + $0x88] sm:$0xff]  ;;  %v864_v51 = vld [vmem:[%s3533_s2 + $0x90] sm:$0xff] }
  0x36   :  { %v1289_v52 = vld [vmem:[%s3534_s3 + $0x90] sm:$0xff] }
  0x38   :  { %2166 = vmatmul.mubr.msk.f32.gmra.mrb[22].mxu0 %vm63_vm1, %v50_v53  ;;  %2228 = vmatmul.mubr.msk.f32.gmra.mrb[22].mxu1 %vm63_vm1, %v444_v54  ;;  %v865_v53 = vld [vmem:[%s3533_s2 + $0x98] sm:$0xff] }
  0x39   :  { %2168 = vmatprep.mubr.msk.f32.mxu0 %vm63_vm1, %v51_v55  ;;  %2230 = vmatprep.mubr.msk.f32.mxu1 %vm63_vm1, %v445_v56  ;;  %v1290_v54 = vld [vmem:[%s3534_s3 + $0x98] sm:$0xff]  ;;  %v866_v55 = vld [vmem:[%s3533_s2 + $0xa0] sm:$0xff] }
  0x3a   :  { %v1291_v56 = vld [vmem:[%s3534_s3 + $0xa0] sm:$0xff] }
  0x3c   :  { %2169 = vmatmul.mubr.msk.f32.gmra.mrb[24].mxu0 %vm63_vm1, %v52_v57  ;;  %2231 = vmatmul.mubr.msk.f32.gmra.mrb[24].mxu1 %vm63_vm1, %v446_v58  ;;  %v867_v57 = vld [vmem:[%s3533_s2 + $0xa8] sm:$0xff] }
  0x3d   :  { %2171 = vmatprep.mubr.msk.f32.mxu0 %vm63_vm1, %v53_v59  ;;  %2233 = vmatprep.mubr.msk.f32.mxu1 %vm63_vm1, %v447_v60  ;;  %v1292_v58 = vld [vmem:[%s3534_s3 + $0xa8] sm:$0xff]  ;;  %v868_v59 = vld [vmem:[%s3533_s2 + $0xb0] sm:$0xff] }
  0x3e   :  { %v1293_v60 = vld [vmem:[%s3534_s3 + $0xb0] sm:$0xff] }
  0x40   :  { %2172 = vmatmul.mubr.msk.f32.gmra.mrb[26].mxu0 %vm63_vm1, %v54_v61  ;;  %2234 = vmatmul.mubr.msk.f32.gmra.mrb[26].mxu1 %vm63_vm1, %v448_v62  ;;  %v869_v61 = vld [vmem:[%s3533_s2 + $0xb8] sm:$0xff] }
  0x41   :  { %2174 = vmatprep.mubr.msk.f32.mxu0 %vm63_vm1, %v55_v63  ;;  %2236 = vmatprep.mubr.msk.f32.mxu1 %vm63_vm1, %v449_v0  ;;  %v1294_v62 = vld [vmem:[%s3534_s3 + $0xb8] sm:$0xff]  ;;  %v870_v63 = vld [vmem:[%s3533_s2 + $0xc0] sm:$0xff] }
  0x42   :  { %v1295_v0 = vld [vmem:[%s3534_s3 + $0xc0] sm:$0xff] }
  0x44   :  { %2175 = vmatmul.mubr.msk.f32.gmra.mrb[28].mxu0 %vm63_vm1, %v56_v1  ;;  %2237 = vmatmul.mubr.msk.f32.gmra.mrb[28].mxu1 %vm63_vm1, %v450_v2  ;;  %v871_v1 = vld [vmem:[%s3533_s2 + $0xc8] sm:$0xff] }
  0x45   :  { %2177 = vmatprep.mubr.msk.f32.mxu0 %vm63_vm1, %v57_v3  ;;  %2239 = vmatprep.mubr.msk.f32.mxu1 %vm63_vm1, %v451_v4  ;;  %v1296_v2 = vld [vmem:[%s3534_s3 + $0xc8] sm:$0xff]  ;;  %v872_v3 = vld [vmem:[%s3533_s2 + $0xd0] sm:$0xff] }
  0x46   :  { %v1297_v4 = vld [vmem:[%s3534_s3 + $0xd0] sm:$0xff] }
  0x48   :  { %2178 = vmatmul.mubr.msk.f32.gmra.mrb[30].mxu0 %vm63_vm1, %v58_v5  ;;  %2240 = vmatmul.mubr.msk.f32.gmra.mrb[30].mxu1 %vm63_vm1, %v452_v6  ;;  %v873_v5 = vld [vmem:[%s3533_s2 + $0xd8] sm:$0xff] }
  0x49   :  { %2180 = vmatprep.mubr.msk.f32.mxu0 %vm63_vm1, %v59_v7  ;;  %2242 = vmatprep.mubr.msk.f32.mxu1 %vm63_vm1, %v453_v8  ;;  %v1298_v6 = vld [vmem:[%s3534_s3 + $0xd8] sm:$0xff]  ;;  %v874_v7 = vld [vmem:[%s3533_s2 + $0xe0] sm:$0xff] }
  0x4a   :  { %v1299_v8 = vld [vmem:[%s3534_s3 + $0xe0] sm:$0xff] }
  0x4c   :  { %2181 = vmatmul.mubr.msk.f32.gmra.mrb[32].mxu0 %vm63_vm1, %v60_v9  ;;  %2243 = vmatmul.mubr.msk.f32.gmra.mrb[32].mxu1 %vm63_vm1, %v454_v10  ;;  %v875_v9 = vld [vmem:[%s3533_s2 + $0xe8] sm:$0xff] }
  0x4d   :  { %2183 = vmatprep.mubr.msk.f32.mxu0 %vm63_vm1, %v61_v11  ;;  %2245 = vmatprep.mubr.msk.f32.mxu1 %vm63_vm1, %v455_v12  ;;  %v1300_v10 = vld [vmem:[%s3534_s3 + $0xe8] sm:$0xff]  ;;  %v876_v11 = vld [vmem:[%s3533_s2 + $0xf0] sm:$0xff] }
  0x4e   :  { %v1301_v12 = vld [vmem:[%s3534_s3 + $0xf0] sm:$0xff] }
  0x50   :  { %2184 = vmatmul.mubr.msk.f32.gmra.mrb[34].mxu0 %vm63_vm1, %v62_v13  ;;  %2246 = vmatmul.mubr.msk.f32.gmra.mrb[34].mxu1 %vm63_vm1, %v456_v14  ;;  %v877_v13 = vld [vmem:[%s3533_s2 + $0xf8] sm:$0xff] }
  0x51   :  { %2256 = vmatprep.mubr.msk.f32.mxu0 %vm63_vm1, %v846_v15  ;;  %2318 = vmatprep.mubr.msk.f32.mxu1 %vm63_vm1, %v1271_v16  ;;  %v1302_v14 = vld [vmem:[%s3534_s3 + $0xf8] sm:$0xff]  ;;  %v878_v15 = vld [vmem:[%s3533_s2 + $0x100] sm:$0xff] }
  0x52   :  { %v1303_v16 = vld [vmem:[%s3534_s3 + $0x100] sm:$0xff] }
  0x54   :  { %2257 = vmatmul.mubr.msk.f32.vlgmr.msra.gmra.mrb[36].mxu0 %vm63_vm1, %v847_v17  ;;  %2319 = vmatmul.mubr.msk.f32.vlgmr.msra.gmra.mrb[36].mxu1 %vm63_vm1, %v1272_v18  ;;  %v879_v17 = vld [vmem:[%s3533_s2 + $0x108] sm:$0xff] }
  0x55   :  { %2259 = vmatprep.mubr.msk.f32.mxu0 %vm63_vm1, %v848_v19  ;;  %2321 = vmatprep.mubr.msk.f32.mxu1 %vm63_vm1, %v1273_v20  ;;  %v1304_v18 = vld [vmem:[%s3534_s3 + $0x108] sm:$0xff]  ;;  %v880_v19 = vld [vmem:[%s3533_s2 + $0x110] sm:$0xff] }
  0x56   :  { %v1305_v20 = vld [vmem:[%s3534_s3 + $0x110] sm:$0xff] }
  0x58   :  { %2260 = vmatmul.mubr.msk.f32.gmra.mrb[38].mxu0 %vm63_vm1, %v849_v21  ;;  %2322 = vmatmul.mubr.msk.f32.gmra.mrb[38].mxu1 %vm63_vm1, %v1274_v22  ;;  %v881_v21 = vld [vmem:[%s3533_s2 + $0x118] sm:$0xff] }
  0x59   :  { %2262 = vmatprep.mubr.msk.f32.mxu0 %vm63_vm1, %v850_v23  ;;  %2324 = vmatprep.mubr.msk.f32.mxu1 %vm63_vm1, %v1275_v24  ;;  %v1306_v22 = vld [vmem:[%s3534_s3 + $0x118] sm:$0xff] }
  0x5c   :  { %2263 = vmatmul.mubr.msk.f32.gmra.mrb[40].mxu0 %vm63_vm1, %v851_v25  ;;  %2325 = vmatmul.mubr.msk.f32.gmra.mrb[40].mxu1 %vm63_vm1, %v1276_v26 }
  0x5d   :  { %2265 = vmatprep.mubr.msk.f32.mxu0 %vm63_vm1, %v852_v27  ;;  %2327 = vmatprep.mubr.msk.f32.mxu1 %vm63_vm1, %v1277_v28 }
  0x60   :  { %2266 = vmatmul.mubr.msk.f32.gmra.mrb[42].mxu0 %vm63_vm1, %v853_v29  ;;  %2328 = vmatmul.mubr.msk.f32.gmra.mrb[42].mxu1 %vm63_vm1, %v1278_v30 }
  0x61   :  { %2268 = vmatprep.mubr.msk.f32.mxu0 %vm63_vm1, %v854_v31  ;;  %2330 = vmatprep.mubr.msk.f32.mxu1 %vm63_vm1, %v1279_v32 }
  0x64   :  { %2269 = vmatmul.mubr.msk.f32.gmra.mrb[44].mxu0 %vm63_vm1, %v855_v33  ;;  %2331 = vmatmul.mubr.msk.f32.gmra.mrb[44].mxu1 %vm63_vm1, %v1280_v34 }
  0x65   :  { %2271 = vmatprep.mubr.msk.f32.mxu0 %vm63_vm1, %v856_v35  ;;  %2333 = vmatprep.mubr.msk.f32.mxu1 %vm63_vm1, %v1281_v36 }
  0x68   :  { %2272 = vmatmul.mubr.msk.f32.gmra.mrb[46].mxu0 %vm63_vm1, %v857_v37  ;;  %2334 = vmatmul.mubr.msk.f32.gmra.mrb[46].mxu1 %vm63_vm1, %v1282_v38 }
  0x69   :  { %2274 = vmatprep.mubr.msk.f32.mxu0 %vm63_vm1, %v858_v39  ;;  %2336 = vmatprep.mubr.msk.f32.mxu1 %vm63_vm1, %v1283_v40 }
  0x6c   :  { %2275 = vmatmul.mubr.msk.f32.gmra.mrb[48].mxu0 %vm63_vm1, %v859_v41  ;;  %2337 = vmatmul.mubr.msk.f32.gmra.mrb[48].mxu1 %vm63_vm1, %v1284_v42 }
  0x6d   :  { %2277 = vmatprep.mubr.msk.f32.mxu0 %vm63_vm1, %v860_v43  ;;  %2339 = vmatprep.mubr.msk.f32.mxu1 %vm63_vm1, %v1285_v44 }
  0x70   :  { %2278 = vmatmul.mubr.msk.f32.gmra.mrb[50].mxu0 %vm63_vm1, %v861_v45  ;;  %2340 = vmatmul.mubr.msk.f32.gmra.mrb[50].mxu1 %vm63_vm1, %v1286_v46 }
  0x71   :  { %2280 = vmatprep.mubr.msk.f32.mxu0 %vm63_vm1, %v862_v47  ;;  %2342 = vmatprep.mubr.msk.f32.mxu1 %vm63_vm1, %v1287_v48 }
  0x74   :  { %2281 = vmatmul.mubr.msk.f32.gmra.mrb[52].mxu0 %vm63_vm1, %v863_v49  ;;  %2343 = vmatmul.mubr.msk.f32.gmra.mrb[52].mxu1 %vm63_vm1, %v1288_v50 }
  0x75   :  { %2283 = vmatprep.mubr.msk.f32.mxu0 %vm63_vm1, %v864_v51  ;;  %2345 = vmatprep.mubr.msk.f32.mxu1 %vm63_vm1, %v1289_v52 }
  0x78   :  { %2284 = vmatmul.mubr.msk.f32.gmra.mrb[54].mxu0 %vm63_vm1, %v865_v53  ;;  %2346 = vmatmul.mubr.msk.f32.gmra.mrb[54].mxu1 %vm63_vm1, %v1290_v54 }
  0x79   :  { %2286 = vmatprep.mubr.msk.f32.mxu0 %vm63_vm1, %v866_v55  ;;  %2348 = vmatprep.mubr.msk.f32.mxu1 %vm63_vm1, %v1291_v56 }
  0x7c   :  { %2287 = vmatmul.mubr.msk.f32.gmra.mrb[56].mxu0 %vm63_vm1, %v867_v57  ;;  %2349 = vmatmul.mubr.msk.f32.gmra.mrb[56].mxu1 %vm63_vm1, %v1292_v58 }
  0x7d   :  { %2289 = vmatprep.mubr.msk.f32.mxu0 %vm63_vm1, %v868_v59  ;;  %2351 = vmatprep.mubr.msk.f32.mxu1 %vm63_vm1, %v1293_v60 }
  0x80   :  { %2290 = vmatmul.mubr.msk.f32.gmra.mrb[58].mxu0 %vm63_vm1, %v869_v61  ;;  %2352 = vmatmul.mubr.msk.f32.gmra.mrb[58].mxu1 %vm63_vm1, %v1294_v62 }
  0x81   :  { %2292 = vmatprep.mubr.msk.f32.mxu0 %vm63_vm1, %v870_v63  ;;  %2354 = vmatprep.mubr.msk.f32.mxu1 %vm63_vm1, %v1295_v0 }
  0x84   :  { %2293 = vmatmul.mubr.msk.f32.gmra.mrb[60].mxu0 %vm63_vm1, %v871_v1  ;;  %2355 = vmatmul.mubr.msk.f32.gmra.mrb[60].mxu1 %vm63_vm1, %v1296_v2 }
  0x85   :  { %2295 = vmatprep.mubr.msk.f32.mxu0 %vm63_vm1, %v872_v3  ;;  %2357 = vmatprep.mubr.msk.f32.mxu1 %vm63_vm1, %v1297_v4 }
  0x88   :  { %2296 = vmatmul.mubr.msk.f32.gmra.mrb[62].mxu0 %vm63_vm1, %v873_v5  ;;  %2358 = vmatmul.mubr.msk.f32.gmra.mrb[62].mxu1 %vm63_vm1, %v1298_v6 }
  0x89   :  { %2298 = vmatprep.mubr.msk.f32.mxu0 %vm63_vm1, %v874_v7  ;;  %2360 = vmatprep.mubr.msk.f32.mxu1 %vm63_vm1, %v1299_v8 }
  0x8c   :  { %2299 = vmatmul.mubr.msk.f32.gmra.mrb[64].mxu0 %vm63_vm1, %v875_v9  ;;  %2361 = vmatmul.mubr.msk.f32.gmra.mrb[64].mxu1 %vm63_vm1, %v1300_v10 }
  0x8d   :  { %2301 = vmatprep.mubr.msk.f32.mxu0 %vm63_vm1, %v876_v11  ;;  %2363 = vmatprep.mubr.msk.f32.mxu1 %vm63_vm1, %v1301_v12 }
  0x90   :  { %2302 = vmatmul.mubr.msk.f32.gmra.mrb[66].mxu0 %vm63_vm1, %v877_v13  ;;  %2364 = vmatmul.mubr.msk.f32.gmra.mrb[66].mxu1 %vm63_vm1, %v1302_v14 }
  0x91   :  { %2304 = vmatprep.mubr.msk.f32.mxu0 %vm63_vm1, %v878_v15  ;;  %2366 = vmatprep.mubr.msk.f32.mxu1 %vm63_vm1, %v1303_v16 }
  0x94   :  { %2305 = vmatmul.mubr.msk.f32.gmra.mrb[68].mxu0 %vm63_vm1, %v879_v17  ;;  %2367 = vmatmul.mubr.msk.f32.gmra.mrb[68].mxu1 %vm63_vm1, %v1304_v18  ;;  %v3282_v18 = vld [vmem:[%s3535_s5] ss:$0 sm:$0xff] }
  0x95   :  { %2307 = vmatprep.mubr.msk.f32.mxu0 %vm63_vm1, %v880_v19  ;;  %2369 = vmatprep.mubr.msk.f32.mxu1 %vm63_vm1, %v1305_v20 }
  0x98   :  { %2308 = vmatmul.mubr.msk.f32.gmra.mrb[70].mxu0 %vm63_vm1, %v881_v21  ;;  %2370 = vmatmul.mubr.msk.f32.gmra.mrb[70].mxu1 %vm63_vm1, %v1306_v22 }
  0xdf   :  { %v3057_v23 = vpop.f32.mrb[0].mxu0  ;;  %v3059_v24 = vpop.f32.mrb[0].mxu1 }
  0xe0   :  { %v3063_v26 = vpop.f32.mrb[1].mxu0  ;;  %v3065_v27 = vpop.f32.mrb[1].mxu1 }
  0xe3   :  { %v3069_v29 = vpop.f32.mrb[2].mxu0  ;;  %v3071_v30 = vpop.f32.mrb[2].mxu1 }
  0xe4   :  { %v3075_v32 = vpop.f32.mrb[3].mxu0  ;;  %v3077_v33 = vpop.f32.mrb[3].mxu1 }
  0xe7   :  { %v3081_v35 = vpop.f32.mrb[4].mxu0  ;;  %v3083_v36 = vpop.f32.mrb[4].mxu1 }
  0xe8   :  { %v3087_v38 = vpop.f32.mrb[5].mxu0  ;;  %v3089_v39 = vpop.f32.mrb[5].mxu1 }
  0xeb   :  { %v3093_v41 = vpop.f32.mrb[6].mxu0  ;;  %v3095_v42 = vpop.f32.mrb[6].mxu1 }
  0xec   :  { %v3099_v44 = vpop.f32.mrb[7].mxu0  ;;  %v3101_v45 = vpop.f32.mrb[7].mxu1 }
  0xef   :  { %v3105_v47 = vpop.f32.mrb[8].mxu0  ;;  %v3107_v48 = vpop.f32.mrb[8].mxu1 }
  0xf0   :  { %v3111_v50 = vpop.f32.mrb[9].mxu0  ;;  %v3113_v51 = vpop.f32.mrb[9].mxu1 }
  0xf3   :  { %v3117_v53 = vpop.f32.mrb[10].mxu0  ;;  %v3119_v54 = vpop.f32.mrb[10].mxu1 }
  0xf4   :  { %v3123_v56 = vpop.f32.mrb[11].mxu0  ;;  %v3125_v57 = vpop.f32.mrb[11].mxu1 }
  0xf7   :  { %v3129_v59 = vpop.f32.mrb[12].mxu0  ;;  %v3131_v60 = vpop.f32.mrb[12].mxu1 }
  0xf8   :  { %v3135_v62 = vpop.f32.mrb[13].mxu0  ;;  %v3137_v63 = vpop.f32.mrb[13].mxu1 }
  0xfb   :  { %v3141_v1 = vpop.f32.mrb[14].mxu0  ;;  %v3143_v2 = vpop.f32.mrb[14].mxu1 }
  0xfc   :  { %v3147_v4 = vpop.f32.mrb[15].mxu0  ;;  %v3149_v5 = vpop.f32.mrb[15].mxu1 }
  0xff   :  { %v3153_v7 = vpop.f32.mrb[16].mxu0  ;;  %v3155_v8 = vpop.f32.mrb[16].mxu1 }
 0x100   :  { %v3159_v10 = vpop.f32.mrb[17].mxu0  ;;  %v3161_v11 = vpop.f32.mrb[17].mxu1 }
 0x103   :  { %v3165_v13 = vpop.f32.mrb[18].mxu0  ;;  %v3167_v14 = vpop.f32.mrb[18].mxu1 }
 0x104   :  { %v3171_v16 = vpop.f32.mrb[19].mxu0  ;;  %v3173_v17 = vpop.f32.mrb[19].mxu1 }
 0x107   :  { %v3177_v19 = vpop.f32.mrb[20].mxu0  ;;  %v3179_v20 = vpop.f32.mrb[20].mxu1 }
 0x108   :  { %v3183_v22 = vpop.f32.mrb[21].mxu0  ;;  %v3185_v12 = vpop.f32.mrb[21].mxu1 }
 0x10b   :  { %v3189_v9 = vpop.f32.mrb[22].mxu0  ;;  %v3191_v6 = vpop.f32.mrb[22].mxu1 }
 0x10c   :  { %v3195_v3 = vpop.f32.mrb[23].mxu0  ;;  %v3197_v0 = vpop.f32.mrb[23].mxu1 }
 0x10f   :  { %v3201_v61 = vpop.f32.mrb[24].mxu0  ;;  %v3203_v58 = vpop.f32.mrb[24].mxu1 }
 0x110   :  { %3562 = vst [vmem:[#allocation2_spill] sm:$0xff] %v3203_v58  ;;  %v3207_v55 = vpop.f32.mrb[25].mxu0  ;;  %v3209_v52 = vpop.f32.mrb[25].mxu1 }
 0x111   :  { %3563 = vst [vmem:[#allocation3_spill] sm:$0xff] %v3207_v55  ;;  %3564 = vst [vmem:[#allocation4_spill] sm:$0xff] %v3209_v52  ;;  %v3586_v52 = vmax.f32 %v3063_v26, %v3065_v27  ;;  %v3588_v27 = vmax.f32 %v3075_v32, %v3077_v33  ;;  %v3590_v33 = vmax.f32 %v3087_v38, %v3089_v39 }
 0x112   :  { %v3592_v39 = vmax.f32 %v3099_v44, %v3101_v45  ;;  %v3594_v45 = vmax.f32 %v3111_v50, %v3113_v51  ;;  %v3596_v51 = vmax.f32 %v3123_v56, %v3125_v57  ;;  %v3598_v57 = vmax.f32 %v3135_v62, %v3137_v63 }
 0x113   :  { %v3213_v49 = vpop.f32.mrb[26].mxu0  ;;  %v3215_v46 = vpop.f32.mrb[26].mxu1  ;;  %v3600_v63 = vmax.f32 %v3147_v4, %v3149_v5  ;;  %v3602_v5 = vmax.f32 %v3159_v10, %v3161_v11  ;;  %v3604_v11 = vmax.f32 %v3171_v16, %v3173_v17  ;;  %v3606_v17 = vmax.f32 %v3183_v22, %v3185_v12 }
 0x114   :  { %3565 = vst [vmem:[#allocation5_spill] sm:$0xff] %v3213_v49  ;;  %3566 = vst [vmem:[#allocation6_spill] sm:$0xff] %v3215_v46  ;;  %v3219_v43 = vpop.f32.mrb[27].mxu0  ;;  %v3221_v40 = vpop.f32.mrb[27].mxu1  ;;  %v3585_v49 = vmax.f32 %v3057_v23, %v3059_v24  ;;  %v3587_v23 = vmax.f32 %v3069_v29, %v3071_v30  ;;  %v3589_v29 = vmax.f32 %v3081_v35, %v3083_v36 }
 0x115   :  { %3567 = vst [vmem:[#allocation7_spill] sm:$0xff] %v3219_v43  ;;  %3568 = vst [vmem:[#allocation8_spill] sm:$0xff] %v3221_v40  ;;  %v3591_v36 = vmax.f32 %v3093_v41, %v3095_v42  ;;  %v3593_v42 = vmax.f32 %v3105_v47, %v3107_v48  ;;  %v3595_v48 = vmax.f32 %v3117_v53, %v3119_v54 }
 0x116   :  { %v3597_v54 = vmax.f32 %v3129_v59, %v3131_v60  ;;  %v3599_v60 = vmax.f32 %v3141_v1, %v3143_v2  ;;  %v3601_v2 = vmax.f32 %v3153_v7, %v3155_v8  ;;  %v3603_v8 = vmax.f32 %v3165_v13, %v3167_v14 }
 0x117   :  { %v3225_v37 = vpop.f32.mrb[28].mxu0  ;;  %v3227_v34 = vpop.f32.mrb[28].mxu1  ;;  %v3605_v14 = vmax.f32 %v3177_v19, %v3179_v20  ;;  %v3607_v20 = vmax.f32 %v3189_v9, %v3191_v6  ;;  %v3608_v22 = vmax.f32 %v3195_v3, %v3197_v0  ;;  %v3609_v9 = vld [vmem:[#allocation2_spill] sm:$0xff] }
 0x118   :  { %3569 = vst [vmem:[#allocation9_spill] sm:$0xff] %v3225_v37  ;;  %3570 = vst [vmem:[#allocation10_spill] sm:$0xff] %v3227_v34  ;;  %v3231_v31 = vpop.f32.mrb[29].mxu0  ;;  %v3233_v28 = vpop.f32.mrb[29].mxu1  ;;  %v3611_v3 = vld [vmem:[#allocation3_spill] sm:$0xff] }
 0x119   :  { %3571 = vst [vmem:[#allocation11_spill] sm:$0xff] %v3231_v31  ;;  %3572 = vst [vmem:[#allocation12_spill] sm:$0xff] %v3233_v28 }
 0x11b   :  { %v3237_v25 = vpop.f32.mrb[30].mxu0  ;;  %v3239_v46 = vpop.f32.mrb[30].mxu1 }
 0x11c   :  { %3573 = vst [vmem:[#allocation13_spill] sm:$0xff] %v3237_v25  ;;  %3574 = vst [vmem:[#allocation14_spill] sm:$0xff] %v3239_v46  ;;  %v3243_v40 = vpop.f32.mrb[31].mxu0  ;;  %v3245_v43 = vpop.f32.mrb[31].mxu1 }
 0x11d   :  { %3575 = vst [vmem:[#allocation15_spill] sm:$0xff] %v3243_v40  ;;  %3576 = vst [vmem:[#allocation16_spill] sm:$0xff] %v3245_v43 }
 0x11f   :  { %v3249_v34 = vpop.f32.mrb[32].mxu0  ;;  %v3251_v37 = vpop.f32.mrb[32].mxu1 }
 0x120   :  { %3577 = vst [vmem:[#allocation17_spill] sm:$0xff] %v3249_v34  ;;  %3578 = vst [vmem:[#allocation18_spill] sm:$0xff] %v3251_v37  ;;  %v3255_v28 = vpop.f32.mrb[33].mxu0  ;;  %v3257_v31 = vpop.f32.mrb[33].mxu1 }
 0x121   :  { %3579 = vst [vmem:[#allocation19_spill] sm:$0xff] %v3255_v28  ;;  %3580 = vst [vmem:[#allocation20_spill] sm:$0xff] %v3257_v31 }
 0x123   :  { %v3261_v46 = vpop.f32.mrb[34].mxu0  ;;  %v3263_v25 = vpop.f32.mrb[34].mxu1 }
 0x124   :  { %3581 = vst [vmem:[#allocation21_spill] sm:$0xff] %v3261_v46  ;;  %3582 = vst [vmem:[#allocation22_spill] sm:$0xff] %v3263_v25  ;;  %v3267_v43 = vpop.f32.mrb[35].mxu0  ;;  %v3269_v40 = vpop.f32.mrb[35].mxu1 }
 0x125   :  { %3583 = vst [vmem:[#allocation23_spill] sm:$0xff] %v3267_v43  ;;  %3584 = vst [vmem:[#allocation24_spill] sm:$0xff] %v3269_v40 }
 0x127   :  { %v2258_v37 = vpop.f32.mrb[36].mxu0  ;;  %v2320_v34 = vpop.f32.mrb[36].mxu1 }
 0x128   :  { %v1236_v15 = vmax.f32 %v3585_v49, %v2258_v37  ;;  %v1056_v31 = vpop.f32.mrb[37].mxu0  ;;  %v1481_v28 = vpop.f32.mrb[37].mxu1 }
 0x129   :  { %v1235_v55 = vmax.f32 %v3586_v52, %v1056_v31 }
 0x12a   :  { %v1661_v25 = vmax.f32 %v1236_v15, %v2320_v34 }
 0x12b   :  { %v1660_v46 = vmax.f32 %v1235_v55, %v1481_v28  ;;  %v2261_v21 = vpop.f32.mrb[38].mxu0  ;;  %v2323_v40 = vpop.f32.mrb[38].mxu1 }
 0x12c   :  { %v1704_v43 = vadd.f32 %v3282_v18, %v1661_v25  ;;  %v1238_v24 = vmax.f32 %v3587_v23, %v2261_v21  ;;  %v1066_v37 = vpop.f32.mrb[39].mxu0  ;;  %v1491_v49 = vpop.f32.mrb[39].mxu1 }
 0x12d   :  { %v1703_v26 = vadd.f32 %v3282_v18, %v1660_v46  ;;  %v1237_v31 = vmax.f32 %v3588_v27, %v1066_v37 }
 0x12e   :  { %v1740_v52 = vmax.f32 %v1704_v43, 0.0  ;;  %v1663_v58 = vmax.f32 %v1238_v24, %v2323_v40 }
 0x12f   :  { %v1739_v34 = vmax.f32 %v1703_v26, 0.0  ;;  %v1662_v28 = vmax.f32 %v1237_v31, %v1491_v49  ;;  %v2264_v55 = vpop.f32.mrb[40].mxu0  ;;  %v2326_v15 = vpop.f32.mrb[40].mxu1 }
 0x130   :  { %1776 = vst [vmem:[%s3536_s6 + $0x8] sm:$0xff] %v1740_v52  ;;  %v1706_v25 = vadd.f32 %v3282_v18, %v1663_v58  ;;  %v1240_v30 = vmax.f32 %v3589_v29, %v2264_v55  ;;  %v1076_v46 = vpop.f32.mrb[41].mxu0  ;;  %v1501_v21 = vpop.f32.mrb[41].mxu1 }
 0x131   :  { %1775 = vst [vmem:[%s3536_s6] sm:$0xff] %v1739_v34  ;;  %v1705_v32 = vadd.f32 %v3282_v18, %v1662_v28  ;;  %v1239_v40 = vmax.f32 %v3590_v33, %v1076_v46 }
 0x132   :  { %v1742_v43 = vmax.f32 %v1706_v25, 0.0  ;;  %v1665_v23 = vmax.f32 %v1240_v30, %v2326_v15 }
 0x133   :  { %v1741_v24 = vmax.f32 %v1705_v32, 0.0  ;;  %v1664_v58 = vmax.f32 %v1239_v40, %v1501_v21  ;;  %v2267_v37 = vpop.f32.mrb[42].mxu0  ;;  %v2329_v49 = vpop.f32.mrb[42].mxu1 }
 0x134   :  { %1778 = vst [vmem:[%s3536_s6 + $0x18] sm:$0xff] %v1742_v43  ;;  %v1708_v35 = vadd.f32 %v3282_v18, %v1665_v23  ;;  %v1242_v26 = vmax.f32 %v3591_v36, %v2267_v37  ;;  %v1086_v27 = vpop.f32.mrb[43].mxu0  ;;  %v1511_v31 = vpop.f32.mrb[43].mxu1 }
 0x135   :  { %1777 = vst [vmem:[%s3536_s6 + $0x10] sm:$0xff] %v1741_v24  ;;  %v1707_v38 = vadd.f32 %v3282_v18, %v1664_v58  ;;  %v1241_v52 = vmax.f32 %v3592_v39, %v1086_v27 }
 0x136   :  { %v1744_v34 = vmax.f32 %v1708_v35, 0.0  ;;  %v1667_v28 = vmax.f32 %v1242_v26, %v2329_v49 }
 0x137   :  { %v1743_v55 = vmax.f32 %v1707_v38, 0.0  ;;  %v1666_v15 = vmax.f32 %v1241_v52, %v1511_v31  ;;  %v2270_v25 = vpop.f32.mrb[44].mxu0  ;;  %v2332_v29 = vpop.f32.mrb[44].mxu1 }
 0x138   :  { %1780 = vst [vmem:[%s3536_s6 + $0x28] sm:$0xff] %v1744_v34  ;;  %v1710_v41 = vadd.f32 %v3282_v18, %v1667_v28  ;;  %v1244_v30 = vmax.f32 %v3593_v42, %v2270_v25  ;;  %v1096_v46 = vpop.f32.mrb[45].mxu0  ;;  %v1521_v21 = vpop.f32.mrb[45].mxu1 }
 0x139   :  { %1779 = vst [vmem:[%s3536_s6 + $0x20] sm:$0xff] %v1743_v55  ;;  %v1709_v44 = vadd.f32 %v3282_v18, %v1666_v15  ;;  %v1243_v32 = vmax.f32 %v3594_v45, %v1096_v46 }
 0x13a   :  { %v1746_v33 = vmax.f32 %v1710_v41, 0.0  ;;  %v1669_v40 = vmax.f32 %v1244_v30, %v2332_v29 }
 0x13b   :  { %v1745_v43 = vmax.f32 %v1709_v44, 0.0  ;;  %v1668_v23 = vmax.f32 %v1243_v32, %v1521_v21  ;;  %v2273_v24 = vpop.f32.mrb[46].mxu0  ;;  %v2335_v58 = vpop.f32.mrb[46].mxu1 }
 0x13c   :  { %1782 = vst [vmem:[%s3536_s6 + $0x38] sm:$0xff] %v1746_v33  ;;  %v1712_v47 = vadd.f32 %v3282_v18, %v1669_v40  ;;  %v1246_v37 = vmax.f32 %v3595_v48, %v2273_v24  ;;  %v1106_v49 = vpop.f32.mrb[47].mxu0  ;;  %v1531_v35 = vpop.f32.mrb[47].mxu1 }
 0x13d   :  { %1781 = vst [vmem:[%s3536_s6 + $0x30] sm:$0xff] %v1745_v43  ;;  %v1711_v50 = vadd.f32 %v3282_v18, %v1668_v23  ;;  %v1245_v36 = vmax.f32 %v3596_v51, %v1106_v49 }
 0x13e   :  { %v1748_v26 = vmax.f32 %v1712_v47, 0.0  ;;  %v1671_v27 = vmax.f32 %v1246_v37, %v2335_v58 }
 0x13f   :  { %v1747_v31 = vmax.f32 %v1711_v50, 0.0  ;;  %v1670_v38 = vmax.f32 %v1245_v36, %v1531_v35  ;;  %v2276_v39 = vpop.f32.mrb[48].mxu0  ;;  %v2338_v52 = vpop.f32.mrb[48].mxu1 }
 0x140   :  { %1784 = vst [vmem:[%s3536_s6 + $0x48] sm:$0xff] %v1748_v26  ;;  %v1714_v53 = vadd.f32 %v3282_v18, %v1671_v27  ;;  %v1248_v34 = vmax.f32 %v3597_v54, %v2276_v39  ;;  %v1116_v28 = vpop.f32.mrb[49].mxu0  ;;  %v1541_v55 = vpop.f32.mrb[49].mxu1 }
 0x141   :  { %1783 = vst [vmem:[%s3536_s6 + $0x40] sm:$0xff] %v1747_v31  ;;  %v1713_v56 = vadd.f32 %v3282_v18, %v1670_v38  ;;  %v1247_v15 = vmax.f32 %v3598_v57, %v1116_v28 }
 0x142   :  { %v1750_v25 = vmax.f32 %v1714_v53, 0.0  ;;  %v1673_v29 = vmax.f32 %v1248_v34, %v2338_v52 }
 0x143   :  { %v1749_v41 = vmax.f32 %v1713_v56, 0.0  ;;  %v1672_v42 = vmax.f32 %v1247_v15, %v1541_v55  ;;  %v2279_v30 = vpop.f32.mrb[50].mxu0  ;;  %v2341_v46 = vpop.f32.mrb[50].mxu1 }
 0x144   :  { %1786 = vst [vmem:[%s3536_s6 + $0x58] sm:$0xff] %v1750_v25  ;;  %v1716_v59 = vadd.f32 %v3282_v18, %v1673_v29  ;;  %v1250_v21 = vmax.f32 %v3599_v60, %v2279_v30  ;;  %v1126_v44 = vpop.f32.mrb[51].mxu0  ;;  %v1551_v45 = vpop.f32.mrb[51].mxu1 }
 0x145   :  { %1785 = vst [vmem:[%s3536_s6 + $0x50] sm:$0xff] %v1749_v41  ;;  %v1715_v62 = vadd.f32 %v3282_v18, %v1672_v42  ;;  %v1249_v32 = vmax.f32 %v3600_v63, %v1126_v44 }
 0x146   :  { %v1752_v33 = vmax.f32 %v1716_v59, 0.0  ;;  %v1675_v40 = vmax.f32 %v1250_v21, %v2341_v46 }
 0x147   :  { %v1751_v43 = vmax.f32 %v1715_v62, 0.0  ;;  %v1674_v23 = vmax.f32 %v1249_v32, %v1551_v45  ;;  %v2282_v24 = vpop.f32.mrb[52].mxu0  ;;  %v2344_v58 = vpop.f32.mrb[52].mxu1 }
 0x148   :  { %1788 = vst [vmem:[%s3536_s6 + $0x68] sm:$0xff] %v1752_v33  ;;  %v1718_v1 = vadd.f32 %v3282_v18, %v1675_v40  ;;  %v1252_v47 = vmax.f32 %v3601_v2, %v2282_v24  ;;  %v1136_v48 = vpop.f32.mrb[53].mxu0  ;;  %v1561_v37 = vpop.f32.mrb[53].mxu1  ;;  %v3610_v24 = vmax.f32 %v3201_v61, %v3609_v9 }
 0x149   :  { %1787 = vst [vmem:[%s3536_s6 + $0x60] sm:$0xff] %v1751_v43  ;;  %v1717_v4 = vadd.f32 %v3282_v18, %v1674_v23  ;;  %v1251_v49 = vmax.f32 %v3602_v5, %v1136_v48 }
 0x14a   :  { %v1754_v35 = vmax.f32 %v1718_v1, 0.0  ;;  %v1677_v50 = vmax.f32 %v1252_v47, %v2344_v58  ;;  %v3612_v47 = vld [vmem:[#allocation4_spill] sm:$0xff] }
 0x14b   :  { %v1753_v51 = vmax.f32 %v1717_v4, 0.0  ;;  %v1676_v36 = vmax.f32 %v1251_v49, %v1561_v37  ;;  %v2285_v26 = vpop.f32.mrb[54].mxu0  ;;  %v2347_v27 = vpop.f32.mrb[54].mxu1  ;;  %v3613_v48 = vmax.f32 %v3611_v3, %v3612_v47 }
 0x14c   :  { %1790 = vst [vmem:[%s3536_s6 + $0x78] sm:$0xff] %v1754_v35  ;;  %v1720_v7 = vadd.f32 %v3282_v18, %v1677_v50  ;;  %v1254_v31 = vmax.f32 %v3603_v8, %v2285_v26  ;;  %v1146_v38 = vpop.f32.mrb[55].mxu0  ;;  %v1571_v39 = vpop.f32.mrb[55].mxu1  ;;  %v3615_v26 = vld [vmem:[#allocation6_spill] sm:$0xff] }
 0x14d   :  { %1789 = vst [vmem:[%s3536_s6 + $0x70] sm:$0xff] %v1753_v51  ;;  %v1719_v10 = vadd.f32 %v3282_v18, %v1676_v36  ;;  %v1253_v52 = vmax.f32 %v3604_v11, %v1146_v38  ;;  %v3614_v36 = vld [vmem:[#allocation5_spill] sm:$0xff] }
 0x14e   :  { %v1756_v53 = vmax.f32 %v1720_v7, 0.0  ;;  %v1679_v54 = vmax.f32 %v1254_v31, %v2347_v27  ;;  %v3616_v27 = vmax.f32 %v3614_v36, %v3615_v26 }
 0x14f   :  { %v1755_v34 = vmax.f32 %v1719_v10, 0.0  ;;  %v1678_v28 = vmax.f32 %v1253_v52, %v1571_v39  ;;  %v2288_v55 = vpop.f32.mrb[56].mxu0  ;;  %v2350_v56 = vpop.f32.mrb[56].mxu1  ;;  %v3617_v39 = vld [vmem:[#allocation7_spill] sm:$0xff]  ;;  %v3618_v10 = vld [vmem:[#allocation8_spill] sm:$0xff] }
 0x150   :  { %1792 = vst [vmem:[%s3536_s6 + $0x88] sm:$0xff] %v1756_v53  ;;  %v1722_v13 = vadd.f32 %v3282_v18, %v1679_v54  ;;  %v1256_v57 = vmax.f32 %v3605_v14, %v2288_v55  ;;  %v1156_v15 = vpop.f32.mrb[57].mxu0  ;;  %v1581_v25 = vpop.f32.mrb[57].mxu1  ;;  %v3619_v11 = vmax.f32 %v3617_v39, %v3618_v10  ;;  %v3620_v14 = vld [vmem:[#allocation9_spill] sm:$0xff] }
 0x151   :  { %1791 = vst [vmem:[%s3536_s6 + $0x80] sm:$0xff] %v1755_v34  ;;  %v1721_v16 = vadd.f32 %v3282_v18, %v1678_v28  ;;  %v1255_v29 = vmax.f32 %v3606_v17, %v1156_v15 }
 0x152   :  { %v1758_v41 = vmax.f32 %v1722_v13, 0.0  ;;  %v1681_v42 = vmax.f32 %v1256_v57, %v2350_v56  ;;  %v3621_v57 = vld [vmem:[#allocation10_spill] sm:$0xff] }
 0x153   :  { %v1757_v30 = vmax.f32 %v1721_v16, 0.0  ;;  %v1680_v46 = vmax.f32 %v1255_v29, %v1581_v25  ;;  %v2291_v59 = vpop.f32.mrb[58].mxu0  ;;  %v2353_v60 = vpop.f32.mrb[58].mxu1  ;;  %v3622_v15 = vmax.f32 %v3620_v14, %v3621_v57 }
 0x154   :  { %1794 = vst [vmem:[%s3536_s6 + $0x98] sm:$0xff] %v1758_v41  ;;  %v1724_v19 = vadd.f32 %v3282_v18, %v1681_v42  ;;  %v1258_v21 = vmax.f32 %v3607_v20, %v2291_v59  ;;  %v1166_v44 = vpop.f32.mrb[59].mxu0  ;;  %v1591_v45 = vpop.f32.mrb[59].mxu1  ;;  %v3623_v41 = vld [vmem:[#allocation11_spill] sm:$0xff]  ;;  %v3624_v42 = vld [vmem:[#allocation12_spill] sm:$0xff] }
 0x155   :  { %1793 = vst [vmem:[%s3536_s6 + $0x90] sm:$0xff] %v1757_v30  ;;  %v1723_v12 = vadd.f32 %v3282_v18, %v1680_v46  ;;  %v1257_v62 = vmax.f32 %v3608_v22, %v1166_v44  ;;  %v3625_v30 = vmax.f32 %v3623_v41, %v3624_v42  ;;  %v3627_v22 = vld [vmem:[#allocation14_spill] sm:$0xff] }
 0x156   :  { %v1760_v63 = vmax.f32 %v1724_v19, 0.0  ;;  %v1683_v32 = vmax.f32 %v1258_v21, %v2353_v60 }
 0x157   :  { %v1759_v33 = vmax.f32 %v1723_v12, 0.0  ;;  %v1682_v40 = vmax.f32 %v1257_v62, %v1591_v45  ;;  %v2294_v43 = vpop.f32.mrb[60].mxu0  ;;  %v2356_v23 = vpop.f32.mrb[60].mxu1  ;;  %v3626_v12 = vld [vmem:[#allocation13_spill] sm:$0xff] }
 0x158   :  { %1796 = vst [vmem:[%s3536_s6 + $0xa8] sm:$0xff] %v1760_v63  ;;  %v1726_v6 = vadd.f32 %v3282_v18, %v1683_v32  ;;  %v1260_v58 = vmax.f32 %v3610_v24, %v2294_v43  ;;  %v1176_v1 = vpop.f32.mrb[61].mxu0  ;;  %v1601_v2 = vpop.f32.mrb[61].mxu1  ;;  %v3628_v62 = vmax.f32 %v3626_v12, %v3627_v22  ;;  %v3629_v43 = vld [vmem:[#allocation15_spill] sm:$0xff] }
 0x159   :  { %1795 = vst [vmem:[%s3536_s6 + $0xa0] sm:$0xff] %v1759_v33  ;;  %v1725_v0 = vadd.f32 %v3282_v18, %v1682_v40  ;;  %v1259_v37 = vmax.f32 %v3613_v48, %v1176_v1  ;;  %v3632_v48 = vld [vmem:[#allocation17_spill] sm:$0xff] }
 0x15a   :  { %v1762_v4 = vmax.f32 %v1726_v6, 0.0  ;;  %v1685_v5 = vmax.f32 %v1260_v58, %v2356_v23  ;;  %v3630_v23 = vld [vmem:[#allocation16_spill] sm:$0xff] }
 0x15b   :  { %v1761_v49 = vmax.f32 %v1725_v0, 0.0  ;;  %v1684_v35 = vmax.f32 %v1259_v37, %v1601_v2  ;;  %v2297_v50 = vpop.f32.mrb[62].mxu0  ;;  %v2359_v51 = vpop.f32.mrb[62].mxu1  ;;  %v3631_v6 = vmax.f32 %v3629_v43, %v3630_v23  ;;  %v3633_v37 = vld [vmem:[#allocation18_spill] sm:$0xff] }
 0x15c   :  { %1798 = vst [vmem:[%s3536_s6 + $0xb8] sm:$0xff] %v1762_v4  ;;  %v1728_v61 = vadd.f32 %v3282_v18, %v1685_v5  ;;  %v1262_v7 = vmax.f32 %v3616_v27, %v2297_v50  ;;  %v1186_v8 = vpop.f32.mrb[63].mxu0  ;;  %v1611_v31 = vpop.f32.mrb[63].mxu1  ;;  %v3634_v4 = vmax.f32 %v3632_v48, %v3633_v37 }
 0x15d   :  { %1797 = vst [vmem:[%s3536_s6 + $0xb0] sm:$0xff] %v1761_v49  ;;  %v1727_v38 = vadd.f32 %v3282_v18, %v1684_v35  ;;  %v1261_v52 = vmax.f32 %v3619_v11, %v1186_v8  ;;  %v3638_v11 = vld [vmem:[#allocation21_spill] sm:$0xff] }
 0x15e   :  { %v1764_v53 = vmax.f32 %v1728_v61, 0.0  ;;  %v1687_v54 = vmax.f32 %v1262_v7, %v2359_v51  ;;  %v3635_v51 = vld [vmem:[#allocation19_spill] sm:$0xff]  ;;  %v3636_v61 = vld [vmem:[#allocation20_spill] sm:$0xff] }
 0x15f   :  { %v1763_v34 = vmax.f32 %v1727_v38, 0.0  ;;  %v1686_v28 = vmax.f32 %v1261_v52, %v1611_v31  ;;  %v2300_v55 = vpop.f32.mrb[64].mxu0  ;;  %v2362_v56 = vpop.f32.mrb[64].mxu1  ;;  %v3637_v36 = vmax.f32 %v3635_v51, %v3636_v61  ;;  %v3639_v52 = vld [vmem:[#allocation22_spill] sm:$0xff] }
 0x160   :  { %1800 = vst [vmem:[%s3536_s6 + $0xc8] sm:$0xff] %v1764_v53  ;;  %v1730_v13 = vadd.f32 %v3282_v18, %v1687_v54  ;;  %v1264_v25 = vmax.f32 %v3622_v15, %v2300_v55  ;;  %v1196_v16 = vpop.f32.mrb[65].mxu0  ;;  %v1621_v17 = vpop.f32.mrb[65].mxu1  ;;  %v3640_v53 = vmax.f32 %v3638_v11, %v3639_v52 }
 0x161   :  { %1799 = vst [vmem:[%s3536_s6 + $0xc0] sm:$0xff] %v1763_v34  ;;  %v1729_v29 = vadd.f32 %v3282_v18, %v1686_v28  ;;  %v1263_v46 = vmax.f32 %v3625_v30, %v1196_v16 }
 0x162   :  { %v1766_v59 = vmax.f32 %v1730_v13, 0.0  ;;  %v1689_v60 = vmax.f32 %v1264_v25, %v2362_v56  ;;  %v3641_v56 = vld [vmem:[#allocation23_spill] sm:$0xff]  ;;  %v3642_v13 = vld [vmem:[#allocation24_spill] sm:$0xff] }
 0x163   :  { %v1765_v19 = vmax.f32 %v1729_v29, 0.0  ;;  %v1688_v20 = vmax.f32 %v1263_v46, %v1621_v17  ;;  %v2303_v21 = vpop.f32.mrb[66].mxu0  ;;  %v2365_v44 = vpop.f32.mrb[66].mxu1  ;;  %v3643_v14 = vmax.f32 %v3641_v56, %v3642_v13 }
 0x164   :  { %1802 = vst [vmem:[%s3536_s6 + $0xd8] sm:$0xff] %v1766_v59  ;;  %v1732_v45 = vadd.f32 %v3282_v18, %v1689_v60  ;;  %v1266_v63 = vmax.f32 %v3628_v62, %v2303_v21  ;;  %v1206_v32 = vpop.f32.mrb[67].mxu0  ;;  %v1631_v33 = vpop.f32.mrb[67].mxu1 }
 0x165   :  { %1801 = vst [vmem:[%s3536_s6 + $0xd0] sm:$0xff] %v1765_v19  ;;  %v1731_v40 = vadd.f32 %v3282_v18, %v1688_v20  ;;  %v1265_v9 = vmax.f32 %v3631_v6, %v1206_v32 }
 0x166   :  { %v1768_v24 = vmax.f32 %v1732_v45, 0.0  ;;  %v1691_v58 = vmax.f32 %v1266_v63, %v2365_v44 }
 0x167   :  { %v1767_v1 = vmax.f32 %v1731_v40, 0.0  ;;  %v1690_v2 = vmax.f32 %v1265_v9, %v1631_v33  ;;  %v2306_v0 = vpop.f32.mrb[68].mxu0  ;;  %v2368_v3 = vpop.f32.mrb[68].mxu1 }
 0x168   :  { %1804 = vst [vmem:[%s3536_s6 + $0xe8] sm:$0xff] %v1768_v24  ;;  %v1734_v47 = vadd.f32 %v3282_v18, %v1691_v58  ;;  %v1268_v5 = vmax.f32 %v3634_v4, %v2306_v0  ;;  %v1216_v49 = vpop.f32.mrb[69].mxu0  ;;  %v1641_v35 = vpop.f32.mrb[69].mxu1 }
 0x169   :  { %1803 = vst [vmem:[%s3536_s6 + $0xe0] sm:$0xff] %v1767_v1  ;;  %v1733_v50 = vadd.f32 %v3282_v18, %v1690_v2  ;;  %v1267_v26 = vmax.f32 %v3637_v36, %v1216_v49 }
 0x16a   :  { %v1770_v27 = vmax.f32 %v1734_v47, 0.0  ;;  %v1693_v7 = vmax.f32 %v1268_v5, %v2368_v3 }
 0x16b   :  { %v1769_v8 = vmax.f32 %v1733_v50, 0.0  ;;  %v1692_v31 = vmax.f32 %v1267_v26, %v1641_v35  ;;  %v2309_v38 = vpop.f32.mrb[70].mxu0  ;;  %v2371_v39 = vpop.f32.mrb[70].mxu1 }
 0x16c   :  { %1806 = vst [vmem:[%s3536_s6 + $0xf8] sm:$0xff] %v1770_v27  ;;  %v1736_v10 = vadd.f32 %v3282_v18, %v1693_v7  ;;  %v1270_v54 = vmax.f32 %v3640_v53, %v2309_v38  ;;  %v1226_v34 = vpop.f32.mrb[71].mxu0  ;;  %v1651_v28 = vpop.f32.mrb[71].mxu1 }
 0x16d   :  { %1805 = vst [vmem:[%s3536_s6 + $0xf0] sm:$0xff] %v1769_v8  ;;  %v1735_v55 = vadd.f32 %v3282_v18, %v1692_v31  ;;  %v1269_v57 = vmax.f32 %v3643_v14, %v1226_v34 }
 0x16e   :  { %v1772_v15 = vmax.f32 %v1736_v10, 0.0  ;;  %v1695_v25 = vmax.f32 %v1270_v54, %v2371_v39 }
 0x16f   :  { %v1771_v16 = vmax.f32 %v1735_v55, 0.0  ;;  %v1694_v17 = vmax.f32 %v1269_v57, %v1651_v28 }
 0x170   :  { %1808 = vst [vmem:[%s3536_s6 + $0x108] sm:$0xff] %v1772_v15  ;;  %v1738_v29 = vadd.f32 %v3282_v18, %v1695_v25 }
 0x171   :  { %1807 = vst [vmem:[%s3536_s6 + $0x100] sm:$0xff] %v1771_v16  ;;  %v1737_v41 = vadd.f32 %v3282_v18, %v1694_v17 }
 0x172   :  { %v1774_v42 = vmax.f32 %v1738_v29, 0.0 }
 0x173   :  { %v1773_v30 = vmax.f32 %v1737_v41, 0.0 }
 0x174   :  { %1810 = vst [vmem:[%s3536_s6 + $0x118] sm:$0xff] %v1774_v42 }
 0x175   :  { %1809 = vst [vmem:[%s3536_s6 + $0x110] sm:$0xff] %v1773_v30 }

// kernel: network_forward.4
= control target key start
LH: loop header
LB: loop body
LE: loop exit
PB: predicated region body
PF: predicated region fallthrough
CT: control target
= control target key end

     0   :  { %v633_v0 = vmov 0.0|0.0   ;;  %vm50_vm0 = vcmask 179200   ;;  %v634_v30 = vmov 0.0   ;;  %vm63_vm1 = vcmask 1045504   ;;  %s958_s4 = inlined_call_operand.vmem [shape: f32[150,128], index: 4, kind: input, shape index: {}]   ;;  %s959_s0 = inlined_call_operand.vmem [shape: f32[32,150], index: 0, kind: input, shape index: {}]   ;;  %s960_s1 = inlined_call_operand.vmem [shape: f32[32,150], index: 1, kind: input, shape index: {}]   ;;  %s961_s2 = inlined_call_operand.vmem [shape: f32[32,150], index: 2, kind: input, shape index: {}]   ;;  %s962_s3 = inlined_call_operand.vmem [shape: f32[32,150], index: 3, kind: input, shape index: {}]   ;;  %s963_s5 = inlined_call_operand.vmem [shape: f32[1,128], index: 5, kind: input, shape index: {}]   ;;  %s964_s6 = inlined_call_operand.vmem [shape: f32[32,128], index: 6, kind: output, shape index: {}]  }
   0x1   :  { %523 = vmatprep.subr.bf16.mxu0 %v633_v0  ;;  %v23_v1 = vld [vmem:[%s958_s4] sm:$0xff]  ;;  %v24_v2 = vld [vmem:[%s958_s4 + $0x8] sm:$0xff]  ;;  %550 = vmatprep.subr.bf16.mxu1 %v633_v0  ;;  %v25_v3 = vld [vmem:[%s958_s4 + $0x10] sm:$0xff] }
   0x2   :  { %v681_v4 = vpack.c.bf16 %v24_v2, %v23_v1  ;;  %v26_v5 = vld [vmem:[%s958_s4 + $0x18] sm:$0xff]  ;;  %v27_v7 = vld [vmem:[%s958_s4 + $0x20] sm:$0xff]  ;;  %v28_v8 = vld [vmem:[%s958_s4 + $0x28] sm:$0xff] }
   0x3   :  { %v688_v6 = vpack.c.bf16 %v26_v5, %v25_v3  ;;  %v43_v9 = vld [vmem:[%s959_s0 + $0x8] sm:$0xff]  ;;  %v703_v10 = vpack.c.bf16 %v28_v8, %v27_v7  ;;  %v29_v12 = vld [vmem:[%s958_s4 + $0x30] sm:$0xff]  ;;  %v30_v13 = vld [vmem:[%s958_s4 + $0x38] sm:$0xff] }
   0x4   :  { %525 = vmatpush1.bf16.msra.mxu0 %v681_v4  ;;  %552 = vmatpush1.bf16.msra.mxu1 %v681_v4  ;;  %v153_v11 = vld [vmem:[%s960_s1 + $0x8] sm:$0xff]  ;;  %v720_v14 = vpack.c.bf16 %v30_v13, %v29_v12  ;;  %v31_v15 = vld [vmem:[%s958_s4 + $0x40] sm:$0xff]  ;;  %v33_v18 = vld [vmem:[%s958_s4 + $0x50] sm:$0xff] }
   0x5   :  { %526 = vmatprep.subr.bf16.mxu0 %v633_v0  ;;  %553 = vmatprep.subr.bf16.mxu1 %v633_v0  ;;  %v32_v16 = vld [vmem:[%s958_s4 + $0x48] sm:$0xff]  ;;  %v34_v19 = vld [vmem:[%s958_s4 + $0x58] sm:$0xff]  ;;  %v35_v21 = vld [vmem:[%s958_s4 + $0x60] sm:$0xff] }
   0x6   :  { %503 = vmatprep.mubr.msk.f32.mxu0 %vm50_vm0, %v43_v9  ;;  %508 = vmatprep.mubr.msk.f32.mxu1 %vm50_vm0, %v153_v11  ;;  %v732_v17 = vpack.c.bf16 %v32_v16, %v31_v15  ;;  %v744_v20 = vpack.c.bf16 %v34_v19, %v33_v18  ;;  %v36_v22 = vld [vmem:[%s958_s4 + $0x68] sm:$0xff]  ;;  %v37_v24 = vld [vmem:[%s958_s4 + $0x70] sm:$0xff]  ;;  %v38_v25 = vld [vmem:[%s958_s4 + $0x78] sm:$0xff] }
   0x7   :  { %v756_v23 = vpack.c.bf16 %v36_v22, %v35_v21  ;;  %v768_v26 = vpack.c.bf16 %v38_v25, %v37_v24  ;;  %v39_v27 = vld [vmem:[%s958_s4 + $0x80] sm:$0xff]  ;;  %v40_v28 = vld [vmem:[%s958_s4 + $0x88] sm:$0xff]  ;;  %v790_v31 = vld [vmem:[%s958_s4 + $0x90] sm:$0x3f] }
   0x8   :  { %528 = vmatpush1.bf16.msra.mxu0 %v688_v6  ;;  %555 = vmatpush1.bf16.msra.mxu1 %v688_v6  ;;  %v780_v29 = vpack.c.bf16 %v40_v28, %v39_v27  ;;  %v42_v32 = vld [vmem:[%s959_s0] sm:$0xff]  ;;  %v45_v34 = vld [vmem:[%s959_s0 + $0x18] sm:$0xff]  ;;  %v44_v35 = vld [vmem:[%s959_s0 + $0x10] sm:$0xff] }
   0x9   :  { %529 = vmatprep.subr.bf16.mxu0 %v633_v0  ;;  %556 = vmatprep.subr.bf16.mxu1 %v633_v0  ;;  %v152_v33 = vld [vmem:[%s960_s1] sm:$0xff]  ;;  %v155_v36 = vld [vmem:[%s960_s1 + $0x18] sm:$0xff]  ;;  %v154_v37 = vld [vmem:[%s960_s1 + $0x10] sm:$0xff] }
   0xa   :  { %v47_v38 = vld [vmem:[%s959_s0 + $0x28] sm:$0xff]  ;;  %v46_v39 = vld [vmem:[%s959_s0 + $0x20] sm:$0xff]  ;;  %v49_v42 = vld [vmem:[%s959_s0 + $0x38] sm:$0xff] }
   0xb   :  { %v157_v40 = vld [vmem:[%s960_s1 + $0x28] sm:$0xff]  ;;  %v156_v41 = vld [vmem:[%s960_s1 + $0x20] sm:$0xff]  ;;  %v48_v43 = vld [vmem:[%s959_s0 + $0x30] sm:$0xff] }
   0xc   :  { %531 = vmatpush1.bf16.msra.mxu0 %v703_v10  ;;  %558 = vmatpush1.bf16.msra.mxu1 %v703_v10  ;;  %v159_v44 = vld [vmem:[%s960_s1 + $0x38] sm:$0xff]  ;;  %v158_v45 = vld [vmem:[%s960_s1 + $0x30] sm:$0xff]  ;;  %v262_v46 = vld [vmem:[%s961_s2 + $0x8] sm:$0xff] }
   0xd   :  { %532 = vmatprep.subr.bf16.mxu0 %v633_v0  ;;  %559 = vmatprep.subr.bf16.mxu1 %v633_v0  ;;  %v371_v47 = vld [vmem:[%s962_s3 + $0x8] sm:$0xff]  ;;  %v261_v48 = vld [vmem:[%s961_s2] sm:$0xff]  ;;  %v264_v49 = vld [vmem:[%s961_s2 + $0x18] sm:$0xff] }
   0xe   :  { %v370_v50 = vld [vmem:[%s962_s3] sm:$0xff]  ;;  %v373_v51 = vld [vmem:[%s962_s3 + $0x18] sm:$0xff]  ;;  %v263_v52 = vld [vmem:[%s961_s2 + $0x10] sm:$0xff] }
   0xf   :  { %v266_v53 = vld [vmem:[%s961_s2 + $0x28] sm:$0xff]  ;;  %v372_v54 = vld [vmem:[%s962_s3 + $0x10] sm:$0xff]  ;;  %v265_v56 = vld [vmem:[%s961_s2 + $0x20] sm:$0xff] }
  0x10   :  { %534 = vmatpush1.bf16.msra.mxu0 %v720_v14  ;;  %561 = vmatpush1.bf16.msra.mxu1 %v720_v14  ;;  %v375_v55 = vld [vmem:[%s962_s3 + $0x28] sm:$0xff]  ;;  %v268_v57 = vld [vmem:[%s961_s2 + $0x38] sm:$0xff]  ;;  %v374_v58 = vld [vmem:[%s962_s3 + $0x20] sm:$0xff] }
  0x11   :  { %535 = vmatprep.subr.bf16.mxu0 %v633_v0  ;;  %562 = vmatprep.subr.bf16.mxu1 %v633_v0  ;;  %v377_v59 = vld [vmem:[%s962_s3 + $0x38] sm:$0xff]  ;;  %v267_v60 = vld [vmem:[%s961_s2 + $0x30] sm:$0xff]  ;;  %v522_v22 = vld [vmem:[%s963_s5] ss:$0 sm:$0xff] }
  0x12   :  { %v376_v61 = vld [vmem:[%s962_s3 + $0x30] sm:$0xff] }
  0x14   :  { %537 = vmatpush1.bf16.msra.mxu0 %v732_v17  ;;  %564 = vmatpush1.bf16.msra.mxu1 %v732_v17 }
  0x15   :  { %538 = vmatprep.subr.bf16.mxu0 %v633_v0  ;;  %565 = vmatprep.subr.bf16.mxu1 %v633_v0 }
  0x18   :  { %540 = vmatpush1.bf16.msra.mxu0 %v744_v20  ;;  %567 = vmatpush1.bf16.msra.mxu1 %v744_v20 }
  0x19   :  { %541 = vmatprep.subr.bf16.mxu0 %v633_v0  ;;  %568 = vmatprep.subr.bf16.mxu1 %v633_v0 }
  0x1c   :  { %543 = vmatpush1.bf16.msra.mxu0 %v756_v23  ;;  %570 = vmatpush1.bf16.msra.mxu1 %v756_v23 }
  0x1d   :  { %544 = vmatprep.subr.bf16.mxu0 %v633_v0  ;;  %571 = vmatprep.subr.bf16.mxu1 %v633_v0 }
  0x20   :  { %546 = vmatpush1.bf16.msra.mxu0 %v768_v26  ;;  %573 = vmatpush1.bf16.msra.mxu1 %v768_v26 }
  0x21   :  { %547 = vmatprep.subr.bf16.mxu0 %v633_v0  ;;  %574 = vmatprep.subr.bf16.mxu1 %v633_v0 }
  0x24   :  { %549 = vmatpush1.bf16.msra.mxu0 %v780_v29  ;;  %576 = vmatpush1.bf16.msra.mxu1 %v780_v29 }
  0x25   :  { %103 = vmatprep.subr.mxu0 %v634_v30  ;;  %208 = vmatprep.subr.mxu1 %v634_v30 }
  0x28   :  { %502 = vmatpush1.msk.msra.mxu0 %vm63_vm1, %v790_v31  ;;  %507 = vmatpush1.msk.msra.mxu1 %vm63_vm1, %v790_v31 }
  0x29   :  { %132 = vmatmul.mubr.f32.vlgmr.msra.gmra.mrb[0].mxu0 %v42_v32  ;;  %577 = vmatprep.subr.bf16.mxu0 %v633_v0 }
  0x2a   :  { %237 = vmatmul.mubr.f32.vlgmr.msra.gmra.mrb[0].mxu1 %v152_v33  ;;  %579 = vmatpush1.bf16.msra.mxu0 %v681_v4 }
  0x2b   :  { %604 = vmatprep.subr.bf16.mxu1 %v633_v0  ;;  %580 = vmatprep.subr.bf16.mxu0 %v633_v0 }
  0x2c   :  { %606 = vmatpush1.bf16.msra.mxu1 %v681_v4  ;;  %504 = vmatprep.mubr.msk.f32.mxu0 %vm50_vm0, %v45_v34 }
  0x2d   :  { %607 = vmatprep.subr.bf16.mxu1 %v633_v0  ;;  %137 = vmatmul.mubr.f32.gmra.mrb[2].mxu0 %v44_v35 }
  0x2e   :  { %582 = vmatpush1.bf16.msra.mxu0 %v688_v6  ;;  %509 = vmatprep.mubr.msk.f32.mxu1 %vm50_vm0, %v155_v36 }
  0x2f   :  { %583 = vmatprep.subr.bf16.mxu0 %v633_v0  ;;  %242 = vmatmul.mubr.f32.gmra.mrb[2].mxu1 %v154_v37 }
  0x30   :  { %609 = vmatpush1.bf16.msra.mxu1 %v688_v6  ;;  %505 = vmatprep.mubr.msk.f32.mxu0 %vm50_vm0, %v47_v38 }
  0x31   :  { %610 = vmatprep.subr.bf16.mxu1 %v633_v0  ;;  %142 = vmatmul.mubr.f32.gmra.mrb[4].mxu0 %v46_v39 }
  0x32   :  { %585 = vmatpush1.bf16.msra.mxu0 %v703_v10  ;;  %510 = vmatprep.mubr.msk.f32.mxu1 %vm50_vm0, %v157_v40 }
  0x33   :  { %586 = vmatprep.subr.bf16.mxu0 %v633_v0  ;;  %247 = vmatmul.mubr.f32.gmra.mrb[4].mxu1 %v156_v41 }
  0x34   :  { %612 = vmatpush1.bf16.msra.mxu1 %v703_v10  ;;  %506 = vmatprep.mubr.msk.f32.mxu0 %vm50_vm0, %v49_v42 }
  0x35   :  { %613 = vmatprep.subr.bf16.mxu1 %v633_v0  ;;  %147 = vmatmul.mubr.f32.gmra.mrb[6].mxu0 %v48_v43 }
  0x36   :  { %588 = vmatpush1.bf16.msra.mxu0 %v720_v14  ;;  %511 = vmatprep.mubr.msk.f32.mxu1 %vm50_vm0, %v159_v44 }
  0x37   :  { %589 = vmatprep.subr.bf16.mxu0 %v633_v0  ;;  %252 = vmatmul.mubr.f32.gmra.mrb[6].mxu1 %v158_v45 }
  0x38   :  { %615 = vmatpush1.bf16.msra.mxu1 %v720_v14  ;;  %513 = vmatprep.mubr.msk.f32.mxu0 %vm50_vm0, %v262_v46 }
  0x39   :  { %616 = vmatprep.subr.bf16.mxu1 %v633_v0  ;;  %518 = vmatprep.mubr.msk.f32.mxu1 %vm50_vm0, %v371_v47 }
  0x3a   :  { %591 = vmatpush1.bf16.msra.mxu0 %v732_v17 }
  0x3b   :  { %592 = vmatprep.subr.bf16.mxu0 %v633_v0 }
  0x3c   :  { %618 = vmatpush1.bf16.msra.mxu1 %v732_v17 }
  0x3d   :  { %619 = vmatprep.subr.bf16.mxu1 %v633_v0 }
  0x3e   :  { %594 = vmatpush1.bf16.msra.mxu0 %v744_v20 }
  0x3f   :  { %595 = vmatprep.subr.bf16.mxu0 %v633_v0 }
  0x40   :  { %621 = vmatpush1.bf16.msra.mxu1 %v744_v20 }
  0x41   :  { %622 = vmatprep.subr.bf16.mxu1 %v633_v0 }
  0x42   :  { %597 = vmatpush1.bf16.msra.mxu0 %v756_v23 }
  0x43   :  { %598 = vmatprep.subr.bf16.mxu0 %v633_v0 }
  0x44   :  { %624 = vmatpush1.bf16.msra.mxu1 %v756_v23 }
  0x45   :  { %625 = vmatprep.subr.bf16.mxu1 %v633_v0 }
  0x46   :  { %600 = vmatpush1.bf16.msra.mxu0 %v768_v26 }
  0x47   :  { %601 = vmatprep.subr.bf16.mxu0 %v633_v0 }
  0x48   :  { %627 = vmatpush1.bf16.msra.mxu1 %v768_v26 }
  0x49   :  { %628 = vmatprep.subr.bf16.mxu1 %v633_v0 }
  0x4a   :  { %603 = vmatpush1.bf16.msra.mxu0 %v780_v29 }
  0x4b   :  { %317 = vmatprep.subr.mxu0 %v634_v30 }
  0x4c   :  { %630 = vmatpush1.bf16.msra.mxu1 %v780_v29 }
  0x4d   :  { %426 = vmatprep.subr.mxu1 %v634_v30 }
  0x4e   :  { %512 = vmatpush1.msk.msra.mxu0 %vm63_vm1, %v790_v31 }
  0x4f   :  { %346 = vmatmul.mubr.f32.vlgmr.msra.gmra.mrb[8].mxu0 %v261_v48 }
  0x50   :  { %517 = vmatpush1.msk.msra.mxu1 %vm63_vm1, %v790_v31  ;;  %514 = vmatprep.mubr.msk.f32.mxu0 %vm50_vm0, %v264_v49 }
  0x51   :  { %455 = vmatmul.mubr.f32.vlgmr.msra.gmra.mrb[8].mxu1 %v370_v50 }
  0x52   :  { %519 = vmatprep.mubr.msk.f32.mxu1 %vm50_vm0, %v373_v51 }
  0x53   :  { %351 = vmatmul.mubr.f32.gmra.mrb[10].mxu0 %v263_v52 }
  0x54   :  { %515 = vmatprep.mubr.msk.f32.mxu0 %vm50_vm0, %v266_v53 }
  0x55   :  { %460 = vmatmul.mubr.f32.gmra.mrb[10].mxu1 %v372_v54 }
  0x56   :  { %520 = vmatprep.mubr.msk.f32.mxu1 %vm50_vm0, %v375_v55 }
  0x57   :  { %356 = vmatmul.mubr.f32.gmra.mrb[12].mxu0 %v265_v56 }
  0x58   :  { %516 = vmatprep.mubr.msk.f32.mxu0 %vm50_vm0, %v268_v57 }
  0x59   :  { %465 = vmatmul.mubr.f32.gmra.mrb[12].mxu1 %v374_v58 }
  0x5a   :  { %521 = vmatprep.mubr.msk.f32.mxu1 %vm50_vm0, %v377_v59 }
  0x5b   :  { %361 = vmatmul.mubr.f32.gmra.mrb[14].mxu0 %v267_v60 }
  0x5d   :  { %470 = vmatmul.mubr.f32.gmra.mrb[14].mxu1 %v376_v61 }
  0xfc   :  { %v133_v62 = vpop.f32.mrb[0].mxu0 }
  0xfd   :  { %v135_v63 = vpop.f32.mrb[1].mxu0  ;;  %v238_v0 = vpop.f32.mrb[0].mxu1 }
  0xfe   :  { %v257_v1 = vmax.f32 %v133_v62, %v238_v0  ;;  %v240_v2 = vpop.f32.mrb[1].mxu1 }
 0x100   :  { %v138_v3 = vpop.f32.mrb[2].mxu0 }
 0x101   :  { %v140_v4 = vpop.f32.mrb[3].mxu0 }
 0x102   :  { %v243_v5 = vpop.f32.mrb[2].mxu1 }
 0x103   :  { %v258_v6 = vmax.f32 %v138_v3, %v243_v5  ;;  %v245_v7 = vpop.f32.mrb[3].mxu1 }
 0x104   :  { %v143_v8 = vpop.f32.mrb[4].mxu0 }
 0x105   :  { %v145_v9 = vpop.f32.mrb[5].mxu0 }
 0x106   :  { %v248_v10 = vpop.f32.mrb[4].mxu1 }
 0x107   :  { %v259_v11 = vmax.f32 %v143_v8, %v248_v10  ;;  %v250_v12 = vpop.f32.mrb[5].mxu1 }
 0x108   :  { %v148_v13 = vpop.f32.mrb[6].mxu0 }
 0x109   :  { %v150_v14 = vpop.f32.mrb[7].mxu0 }
 0x10a   :  { %v253_v15 = vpop.f32.mrb[6].mxu1 }
 0x10b   :  { %v260_v16 = vmax.f32 %v148_v13, %v253_v15  ;;  %v255_v17 = vpop.f32.mrb[7].mxu1 }
 0x122   :  { %v347_v18 = vpop.f32.mrb[8].mxu0 }
 0x123   :  { %v366_v19 = vmax.f32 %v257_v1, %v347_v18  ;;  %v349_v20 = vpop.f32.mrb[9].mxu0 }
 0x124   :  { %v456_v21 = vpop.f32.mrb[8].mxu1 }
 0x125   :  { %v475_v23 = vmax.f32 %v366_v19, %v456_v21  ;;  %v458_v24 = vpop.f32.mrb[9].mxu1 }
 0x126   :  { %v352_v25 = vpop.f32.mrb[10].mxu0 }
 0x127   :  { %v486_v26 = vadd.f32 %v522_v22, %v475_v23  ;;  %v367_v27 = vmax.f32 %v258_v6, %v352_v25  ;;  %v354_v28 = vpop.f32.mrb[11].mxu0 }
 0x128   :  { %v461_v29 = vpop.f32.mrb[10].mxu1 }
 0x129   :  { %v490_v30 = vmax.f32 %v486_v26, 0.0  ;;  %v476_v31 = vmax.f32 %v367_v27, %v461_v29  ;;  %v463_v32 = vpop.f32.mrb[11].mxu1 }
 0x12a   :  { %v357_v33 = vpop.f32.mrb[12].mxu0 }
 0x12b   :  { %494 = vst [vmem:[%s964_s6] sm:$0xff] %v490_v30  ;;  %v487_v34 = vadd.f32 %v522_v22, %v476_v31  ;;  %v368_v35 = vmax.f32 %v259_v11, %v357_v33  ;;  %v359_v36 = vpop.f32.mrb[13].mxu0 }
 0x12c   :  { %v466_v37 = vpop.f32.mrb[12].mxu1 }
 0x12d   :  { %v491_v38 = vmax.f32 %v487_v34, 0.0  ;;  %v477_v39 = vmax.f32 %v368_v35, %v466_v37  ;;  %v468_v40 = vpop.f32.mrb[13].mxu1 }
 0x12e   :  { %v362_v41 = vpop.f32.mrb[14].mxu0 }
 0x12f   :  { %495 = vst [vmem:[%s964_s6 + $0x8] sm:$0xff] %v491_v38  ;;  %v488_v42 = vadd.f32 %v522_v22, %v477_v39  ;;  %v369_v43 = vmax.f32 %v260_v16, %v362_v41  ;;  %v364_v44 = vpop.f32.mrb[15].mxu0 }
 0x130   :  { %v471_v45 = vpop.f32.mrb[14].mxu1 }
 0x131   :  { %v492_v46 = vmax.f32 %v488_v42, 0.0  ;;  %v478_v47 = vmax.f32 %v369_v43, %v471_v45  ;;  %v473_v48 = vpop.f32.mrb[15].mxu1 }
 0x133   :  { %496 = vst [vmem:[%s964_s6 + $0x10] sm:$0xff] %v492_v46  ;;  %v489_v49 = vadd.f32 %v522_v22, %v478_v47 }
 0x135   :  { %v493_v50 = vmax.f32 %v489_v49, 0.0 }
 0x137   :  { %497 = vst [vmem:[%s964_s6 + $0x18] sm:$0xff] %v493_v50 }

// kernel: network_forward.5
= control target key start
LH: loop header
LB: loop body
LE: loop exit
PB: predicated region body
PF: predicated region fallthrough
CT: control target
= control target key end

     0   :  { %v566_v3 = vmov 0.0|0.0   ;;  %vm69_vm0 = vcmask 523264   ;;  %s837_s0 = inlined_call_operand.vmem [shape: f32[2,192], index: 0, kind: input, shape index: {}]   ;;  %s838_s1 = inlined_call_operand.vmem [shape: f32[192,128], index: 1, kind: input, shape index: {}]   ;;  %s839_s2 = inlined_call_operand.vmem [shape: f32[1,128], index: 2, kind: input, shape index: {}]   ;;  %s840_s3 = inlined_call_operand.vmem [shape: f32[128,128], index: 3, kind: input, shape index: {}]   ;;  %s841_s4 = inlined_call_operand.vmem [shape: f32[1,128], index: 4, kind: input, shape index: {}]   ;;  %s842_s5 = inlined_call_operand.vmem [shape: f32[128,128], index: 5, kind: input, shape index: {}]   ;;  %s843_s6 = inlined_call_operand.vmem [shape: f32[1,128], index: 6, kind: input, shape index: {}]   ;;  %s844_s7 = inlined_call_operand.hbm [shape: f32[2,128], index: 7, kind: output, shape index: {}]  }
   0x1   :  { %v28_v0 = vld [vmem:[%s838_s1] sm:$0xff]  ;;  %v29_v1 = vld [vmem:[%s838_s1 + $0x8] sm:$0xff]  ;;  %v30_v2 = vld [vmem:[%s838_s1 + $0x10] sm:$0xff]  ;;  %454 = vmatprep.subr.bf16.mxu0 %v566_v3  ;;  %490 = vmatprep.subr.bf16.mxu1 %v566_v3 }
   0x2   :  { %v455_v4 = vpack.c.bf16 %v29_v1, %v28_v0  ;;  %v31_v5 = vld [vmem:[%s838_s1 + $0x18] sm:$0xff]  ;;  %v32_v7 = vld [vmem:[%s838_s1 + $0x20] sm:$0xff]  ;;  %v33_v8 = vld [vmem:[%s838_s1 + $0x28] sm:$0xff] }
   0x3   :  { %v458_v6 = vpack.c.bf16 %v31_v5, %v30_v2  ;;  %v461_v9 = vpack.c.bf16 %v33_v8, %v32_v7  ;;  %v34_v10 = vld [vmem:[%s838_s1 + $0x30] sm:$0xff]  ;;  %v35_v11 = vld [vmem:[%s838_s1 + $0x38] sm:$0xff]  ;;  %v641_v12 = vld.sshfl [vmem:[%s837_s0] sm:$0x33 pattern:$0x76325410] }
   0x4   :  { %456 = vmatpush1.bf16.msra.mxu0 %v455_v4  ;;  %v143_v13 = vld [vmem:[%s840_s3] sm:$0xff]  ;;  %v144_v14 = vld [vmem:[%s840_s3 + $0x8] sm:$0xff]  ;;  %v67_v15 = vcombine.high %v641_v12, %v641_v12  ;;  %v145_v17 = vld [vmem:[%s840_s3 + $0x10] sm:$0xff]  ;;  %v464_v19 = vpack.c.bf16 %v35_v11, %v34_v10 }
   0x5   :  { %457 = vmatprep.subr.bf16.mxu0 %v566_v3  ;;  %v491_v16 = vpack.c.bf16 %v144_v14, %v143_v13  ;;  %v146_v18 = vld [vmem:[%s840_s3 + $0x18] sm:$0xff]  ;;  %v36_v20 = vld [vmem:[%s838_s1 + $0x40] sm:$0xff]  ;;  %v37_v21 = vld [vmem:[%s838_s1 + $0x48] sm:$0xff] }
   0x6   :  { %347 = vmatprep.mubr.msk.f32.mxu0 %vm69_vm0, %v67_v15  ;;  %v494_v22 = vpack.c.bf16 %v146_v18, %v145_v17  ;;  %v147_v23 = vld [vmem:[%s840_s3 + $0x20] sm:$0xff]  ;;  %v148_v24 = vld [vmem:[%s840_s3 + $0x28] sm:$0xff] }
   0x7   :  { %492 = vmatpush3.bf16.msra.mxu1 %v491_v16 }
   0x8   :  { %459 = vmatpush1.bf16.msra.mxu0 %v458_v6  ;;  %493 = vmatprep.subr.bf16.mxu1 %v566_v3 }
   0x9   :  { %460 = vmatprep.subr.bf16.mxu0 %v566_v3 }
   0xc   :  { %462 = vmatpush1.bf16.msra.mxu0 %v461_v9 }
   0xd   :  { %463 = vmatprep.subr.bf16.mxu0 %v566_v3 }
   0xe   :  { %12 = vsyncpa [#allocation3], 0  ;;  %v467_v25 = vpack.c.bf16 %v37_v21, %v36_v20  ;;  %v38_v26 = vld [vmem:[%s838_s1 + $0x50] sm:$0xff]  ;;  %v39_v27 = vld [vmem:[%s838_s1 + $0x58] sm:$0xff]  ;;  %495 = vmatpush3.bf16.msra.mxu1 %v494_v22  ;;  %v497_v28 = vpack.c.bf16 %v148_v24, %v147_v23  ;;  %vm567_vm1 = vmmov 0   ;;  %v568_v63 = vmov 0.0  }
   0xf   :  { %496 = vmatprep.subr.bf16.mxu1 %v566_v3  ;;  %v149_v29 = vld [vmem:[%s840_s3 + $0x30] sm:$0xff]  ;;  %v150_v30 = vld [vmem:[%s840_s3 + $0x38] sm:$0xff]  ;;  %v470_v31 = vpack.c.bf16 %v39_v27, %v38_v26  ;;  %v40_v32 = vld [vmem:[%s838_s1 + $0x60] sm:$0xff]  ;;  %416 = vmatprep.mubr.msk.f32.mxu1 %vm567_vm1, %v568_v63  ;;  %s569_s19 = smov [#allocation2]  }
  0x10   :  { %465 = vmatpush1.bf16.msra.mxu0 %v464_v19  ;;  %v41_v33 = vld [vmem:[%s838_s1 + $0x68] sm:$0xff]  ;;  %v500_v34 = vpack.c.bf16 %v150_v30, %v149_v29  ;;  %v151_v35 = vld [vmem:[%s840_s3 + $0x40] sm:$0xff]  ;;  %v42_v38 = vld [vmem:[%s838_s1 + $0x70] sm:$0xff]  ;;  %s337_s20 = sshll.u32 %s569_s19, 4  ;;  %s338_s20 = int_to_ptr.vmem [resolvable:$true] %s337_s20 }
  0x11   :  { %466 = vmatprep.subr.bf16.mxu0 %v566_v3  ;;  %v152_v36 = vld [vmem:[%s840_s3 + $0x48] sm:$0xff]  ;;  %v473_v37 = vpack.c.bf16 %v41_v33, %v40_v32  ;;  %v43_v39 = vld [vmem:[%s838_s1 + $0x78] sm:$0xff]  ;;  %v153_v41 = vld [vmem:[%s840_s3 + $0x50] sm:$0xff]  ;;  %p547_p1 = scmp.lt.s32.totalorder %s338_s20, %s338_s20 }
  0x12   :  { %498 = vmatpush3.bf16.msra.mxu1 %v497_v28  ;;  %v503_v40 = vpack.c.bf16 %v152_v36, %v151_v35  ;;  %v154_v42 = vld [vmem:[%s840_s3 + $0x58] sm:$0xff]  ;;  %v476_v43 = vpack.c.bf16 %v43_v39, %v42_v38  ;;  %v44_v44 = vld [vmem:[%s838_s1 + $0x80] sm:$0xff]  ;;  %v45_v45 = vld [vmem:[%s838_s1 + $0x88] sm:$0xff] }
  0x13   :  { %499 = vmatprep.subr.bf16.mxu1 %v566_v3  ;;  %v506_v46 = vpack.c.bf16 %v154_v42, %v153_v41  ;;  %v155_v47 = vld [vmem:[%s840_s3 + $0x60] sm:$0xff]  ;;  %v156_v48 = vld [vmem:[%s840_s3 + $0x68] sm:$0xff]  ;;  %v479_v49 = vpack.c.bf16 %v45_v45, %v44_v44  ;;  %v46_v50 = vld [vmem:[%s838_s1 + $0x90] sm:$0xff] }
  0x14   :  { %468 = vmatpush1.bf16.msra.mxu0 %v467_v25  ;;  %v47_v51 = vld [vmem:[%s838_s1 + $0x98] sm:$0xff]  ;;  %v509_v52 = vpack.c.bf16 %v156_v48, %v155_v47  ;;  %v48_v54 = vld [vmem:[%s838_s1 + $0xa0] sm:$0xff]  ;;  %v49_v55 = vld [vmem:[%s838_s1 + $0xa8] sm:$0xff] }
  0x15   :  { %469 = vmatprep.subr.bf16.mxu0 %v566_v3  ;;  %v482_v53 = vpack.c.bf16 %v47_v51, %v46_v50  ;;  %v485_v56 = vpack.c.bf16 %v49_v55, %v48_v54  ;;  %v50_v57 = vld [vmem:[%s838_s1 + $0xb0] sm:$0xff]  ;;  %v51_v58 = vld [vmem:[%s838_s1 + $0xb8] sm:$0xff]  ;;  %v345_v0 = vld [vmem:[%s839_s2] ss:$0 sm:$0xff] }
  0x16   :  { %501 = vmatpush3.bf16.msra.mxu1 %v500_v34  ;;  %v488_v59 = vpack.c.bf16 %v51_v58, %v50_v57  ;;  %v157_v60 = vld [vmem:[%s840_s3 + $0x70] sm:$0xff]  ;;  %v158_v61 = vld [vmem:[%s840_s3 + $0x78] sm:$0xff]  ;;  %v237_v1 = vld [vmem:[%s842_s5] sm:$0xff] }
  0x17   :  { %502 = vmatprep.subr.bf16.mxu1 %v566_v3  ;;  %v512_v62 = vpack.c.bf16 %v158_v61, %v157_v60  ;;  %v238_v2 = vld [vmem:[%s842_s5 + $0x8] sm:$0xff]  ;;  %v239_v9 = vld [vmem:[%s842_s5 + $0x10] sm:$0xff]  ;;  %v240_v10 = vld [vmem:[%s842_s5 + $0x18] sm:$0xff] }
  0x18   :  { %471 = vmatpush1.bf16.msra.mxu0 %v470_v31  ;;  %v515_v7 = vpack.c.bf16 %v238_v2, %v237_v1  ;;  %v518_v11 = vpack.c.bf16 %v240_v10, %v239_v9  ;;  %v242_v13 = vld [vmem:[%s842_s5 + $0x28] sm:$0xff]  ;;  %v243_v15 = vld [vmem:[%s842_s5 + $0x30] sm:$0xff]  ;;  %v244_v16 = vld [vmem:[%s842_s5 + $0x38] sm:$0xff] }
  0x19   :  { %472 = vmatprep.subr.bf16.mxu0 %v566_v3  ;;  %v524_v17 = vpack.c.bf16 %v244_v16, %v243_v15  ;;  %v245_v18 = vld [vmem:[%s842_s5 + $0x40] sm:$0xff]  ;;  %v246_v19 = vld [vmem:[%s842_s5 + $0x48] sm:$0xff]  ;;  %v247_v21 = vld [vmem:[%s842_s5 + $0x50] sm:$0xff] }
  0x1a   :  { %504 = vmatpush3.bf16.msra.mxu1 %v503_v40  ;;  %v527_v20 = vpack.c.bf16 %v246_v19, %v245_v18  ;;  %v248_v22 = vld [vmem:[%s842_s5 + $0x58] sm:$0xff]  ;;  %v249_v24 = vld [vmem:[%s842_s5 + $0x60] sm:$0xff]  ;;  %v250_v25 = vld [vmem:[%s842_s5 + $0x68] sm:$0xff] }
  0x1b   :  { %505 = vmatprep.subr.bf16.mxu1 %v566_v3  ;;  %v530_v23 = vpack.c.bf16 %v248_v22, %v247_v21  ;;  %v533_v26 = vpack.c.bf16 %v250_v25, %v249_v24  ;;  %v251_v27 = vld [vmem:[%s842_s5 + $0x70] sm:$0xff]  ;;  %v252_v28 = vld [vmem:[%s842_s5 + $0x78] sm:$0xff]  ;;  %v348_v30 = vld [vmem:[%s841_s4] ss:$0 sm:$0xff] }
  0x1c   :  { %474 = vmatpush1.bf16.msra.mxu0 %v473_v37  ;;  %v536_v29 = vpack.c.bf16 %v252_v28, %v251_v27 }
  0x1d   :  { %475 = vmatprep.subr.bf16.mxu0 %v566_v3 }
  0x1e   :  { %507 = vmatpush3.bf16.msra.mxu1 %v506_v46 }
  0x1f   :  { %508 = vmatprep.subr.bf16.mxu1 %v566_v3 }
  0x20   :  { %477 = vmatpush1.bf16.msra.mxu0 %v476_v43 }
  0x21   :  { %478 = vmatprep.subr.bf16.mxu0 %v566_v3 }
  0x22   :  { %510 = vmatpush3.bf16.msra.mxu1 %v509_v52 }
  0x23   :  { %511 = vmatprep.subr.bf16.mxu1 %v566_v3 }
  0x24   :  { %480 = vmatpush1.bf16.msra.mxu0 %v479_v49 }
  0x25   :  { %481 = vmatprep.subr.bf16.mxu0 %v566_v3 }
  0x26   :  { %513 = vmatpush3.bf16.msra.mxu1 %v512_v62 }
  0x27   :  { %514 = vmatprep.subr.bf16.mxu1 %v566_v3 }
  0x28   :  { %483 = vmatpush1.bf16.msra.mxu0 %v482_v53 }
  0x29   :  { %484 = vmatprep.subr.bf16.mxu0 %v566_v3 }
  0x2c   :  { %486 = vmatpush1.bf16.msra.mxu0 %v485_v56 }
  0x2d   :  { %487 = vmatprep.subr.bf16.mxu0 %v566_v3 }
  0x30   :  { %489 = vmatpush1.bf16.msra.mxu0 %v488_v59 }
  0x33   :  { %137 = vmatmul.mubr.f32.vlgmr.msra.gmra.mrb[0].mxu0 %v641_v12  ;;  %v241_v12 = vld [vmem:[%s842_s5 + $0x20] sm:$0xff]  ;;  %s542_s5 = scalar_lea.vmem %s338_s20, 32 }
  0x34   :  { %v521_v14 = vpack.c.bf16 %v242_v13, %v241_v12  ;;  %p543_p0 = scmp.ne.s32.totalorder %s338_s20, %s542_s5  ;;  %p548_p2 = scmp.lt.s32.totalorder %s542_s5, %s542_s5 }
  0x36   :  { %p549_p3 = por %p548_p2, %p547_p1 }
  0x38   :  { %p550_p4 = pnand %p549_p3, %p543_p0 }
 0x106   :  { %v138_v4 = vpop.f32.mrb[0].mxu0 }
 0x107   :  { %v139_v5 = vadd.f32 %v345_v0, %v138_v4  ;;  %v140_v6 = vpop.f32.mrb[1].mxu0 }
 0x109   :  { %v142_v8 = vmax.f32 %v139_v5, 0.0 }
 0x10b   :  { %417 = vmatmul.mubr.f32.vlgmr.msra.gmra.mrb[0].mxu1 %v142_v8 }
 0x10c   :  { %516 = vmatpush3.bf16.msra.mxu1 %v515_v7  ;;  %451 = vmatprep.mubr.msk.f32.mxu1 %vm567_vm1, %v568_v63 }
 0x10d   :  { %517 = vmatprep.subr.bf16.mxu1 %v566_v3 }
 0x110   :  { %519 = vmatpush3.bf16.msra.mxu1 %v518_v11 }
 0x111   :  { %520 = vmatprep.subr.bf16.mxu1 %v566_v3 }
 0x114   :  { %522 = vmatpush3.bf16.msra.mxu1 %v521_v14 }
 0x115   :  { %523 = vmatprep.subr.bf16.mxu1 %v566_v3 }
 0x118   :  { %525 = vmatpush3.bf16.msra.mxu1 %v524_v17 }
 0x119   :  { %526 = vmatprep.subr.bf16.mxu1 %v566_v3 }
 0x11c   :  { %528 = vmatpush3.bf16.msra.mxu1 %v527_v20 }
 0x11d   :  { %529 = vmatprep.subr.bf16.mxu1 %v566_v3 }
 0x120   :  { %531 = vmatpush3.bf16.msra.mxu1 %v530_v23 }
 0x121   :  { %532 = vmatprep.subr.bf16.mxu1 %v566_v3 }
 0x124   :  { %534 = vmatpush3.bf16.msra.mxu1 %v533_v26 }
 0x125   :  { %535 = vmatprep.subr.bf16.mxu1 %v566_v3  ;;  %v349_v3 = vld [vmem:[%s843_s6] ss:$0 sm:$0xff] }
 0x128   :  { %537 = vmatpush3.bf16.msra.mxu1 %v536_v29 }
 0x1de   :  { %v232_v31 = vpop.f32.mrb[0].mxu1 }
 0x1df   :  { %v233_v32 = vadd.f32 %v348_v30, %v232_v31  ;;  %v418_v33 = vpop.f32.mrb[1].mxu1 }
 0x1e1   :  { %v236_v34 = vmax.f32 %v233_v32, 0.0 }
 0x1e3   :  { %452 = vmatmul.mubr.f32.vlgmr.msra.gmra.mrb[2].mxu1 %v236_v34 }
 0x2b6   :  { %v326_v35 = vpop.f32.mrb[2].mxu1 }
 0x2b7   :  { %v327_v36 = vadd.f32 %v349_v3, %v326_v35  ;;  %v453_v37 = vpop.f32.mrb[3].mxu1 }
 0x2b9   :  { %330 = vst [vmem:[#allocation2] sm:$0x3] %v327_v36 }
 0x2ba   :  { %553 = shalt.err (!%p550_p4)
}
 0x2bb   :  { %s554_s22 = scalar_lea.hbm %s844_s7, 32 }
 0x2bc   :  { %p555_p5 = scmp.ne.s32.totalorder %s844_s7, %s554_s22  ;;  %p558_p6 = scmp.lt.u32.totalorder %s554_s22, %s844_s7 }
 0x2be   :  { %p560_p7 = pnand %p558_p6, %p555_p5 }
 0x2c0   :  { %563 = shalt.err (!%p560_p7)
}
 0x2c1   :  { %340 = dma.vmem_to_hbm [thread:$0]  %s338_s20, 32, %s844_s7, [#allocation3]  }
 0x2c2   :  { %564 = dma.done.wait [#allocation3], 32  }
 0x2c3   :  { %565 = vsyncadd [#allocation3], 4294967264 }
 0x2c4   :  { %344 = vsyncpa [#allocation3], 1 }

</bundles_post_ra>
